<compile_context>
chip_gen: v7x
topology: tpu7x:2x2x1
jax: 0.10.0
libtpu: 0.0.40
codegen_flags: <defaults>
</compile_context>

<pallas_src>
import functools

import jax
import jax.numpy as jnp
import numpy as np
from jax import lax
from jax.experimental import pallas as pl
from jax.experimental.pallas import tpu as pltpu


# ----------------------------------------------------------------------------
# Single fused kernel: n_layers x LSTM (zero init state) + FC, everything in
# VMEM, gate order follows PyTorch: [i, f, g, o].
# ----------------------------------------------------------------------------
def _fused_lstm_fc_kernel(*refs, T, B, D, H, n_layers):
    x_ref = refs[0]
    wfc_ref = refs[1 + 3 * n_layers]
    bfc_ref = refs[2 + 3 * n_layers]
    o_ref = refs[3 + 3 * n_layers]

    # Batch-first (B, T, D) -> time-major (T*B, D) via static slices + concat
    # (avoids an in-kernel transpose and any wrapper-side transpose op).
    xv = x_ref[...]  # (B, T, D)
    h_all = jnp.concatenate([xv[:, t, :] for t in range(T)], axis=0)  # (T*B, D)

    for layer in range(n_layers):
        wih = refs[1 + 3 * layer][...]  # (D_in, 4H)
        whh = refs[2 + 3 * layer][...]  # (H,    4H)
        b = refs[3 + 3 * layer][...]    # (1,    4H)  (b_ih + b_hh)

        # Hoisted input projection: one batched matmul over all T timesteps,
        # bias folded in here (not re-added every step).
        xp = (
            jnp.dot(h_all, wih, preferred_element_type=jnp.float32) + b
        )  # (T*B, 4H), time-major

        h = jnp.zeros((B, H), jnp.float32)
        c = jnp.zeros((B, H), jnp.float32)
        outs = []
        # Statically unrolled recurrence (small static T) -> static slices,
        # only h @ W_hh + gate math per step.
        for t in range(T):
            gates = xp[t * B:(t + 1) * B, :] + jnp.dot(
                h, whh, preferred_element_type=jnp.float32
            )  # (B, 4H)
            i_g = jax.nn.sigmoid(gates[:, 0 * H:1 * H])
            f_g = jax.nn.sigmoid(gates[:, 1 * H:2 * H])
            g_g = jnp.tanh(gates[:, 2 * H:3 * H])
            o_g = jax.nn.sigmoid(gates[:, 3 * H:4 * H])
            c = f_g * c + i_g * g_g
            h = o_g * jnp.tanh(c)
            outs.append(h)
        h_all = jnp.concatenate(outs, axis=0)  # (T*B, H), time-major

    # Fused FC head, batched over all timesteps.
    fc = (
        jnp.dot(h_all, wfc_ref[...], preferred_element_type=jnp.float32)
        + bfc_ref[...]
    )  # (T*B, H), time-major

    # Back to batch-first, stored lane-dense as (B, T*H): column block
    # [t*H:(t+1)*H] of row b is the FC output at (batch b, time t).
    out = jnp.concatenate([fc[t * B:(t + 1) * B, :] for t in range(T)], axis=1)
    o_ref[...] = out.astype(o_ref.dtype)


# ----------------------------------------------------------------------------
# Model: 2-layer LSTM (zero initial state, as in MYModel.init_hidden) + Linear.
# ----------------------------------------------------------------------------
def init_params(key, input_dim, hidden_dim, n_layers=2):
    k = 1.0 / np.sqrt(hidden_dim)
    params = {}
    keys = jax.random.split(key, 4 * n_layers + 2)
    ki = 0
    for layer in range(n_layers):
        d_in = input_dim if layer == 0 else hidden_dim
        w_ih = jax.random.uniform(keys[ki], (d_in, 4 * hidden_dim), jnp.float32, -k, k); ki += 1
        w_hh = jax.random.uniform(keys[ki], (hidden_dim, 4 * hidden_dim), jnp.float32, -k, k); ki += 1
        b_ih = jax.random.uniform(keys[ki], (4 * hidden_dim,), jnp.float32, -k, k); ki += 1
        b_hh = jax.random.uniform(keys[ki], (4 * hidden_dim,), jnp.float32, -k, k); ki += 1
        params[f"w_ih_{layer}"] = w_ih
        params[f"w_hh_{layer}"] = w_hh
        params[f"b_{layer}"] = (b_ih + b_hh).reshape(1, 4 * hidden_dim)
    params["w_fc"] = jax.random.uniform(keys[ki], (hidden_dim, hidden_dim), jnp.float32, -k, k); ki += 1
    params["b_fc"] = jax.random.uniform(keys[ki], (hidden_dim,), jnp.float32, -k, k).reshape(1, hidden_dim)
    return params


@functools.partial(jax.jit, static_argnames=("n_layers",))
def my_model_forward(x, params, n_layers=2):
    """x: (B, T, input_dim) -> (B, T, hidden_dim).  Single fused pallas_call."""
    B, T, D = x.shape
    H = params["w_hh_0"].shape[0]
    x = x.astype(jnp.float32)

    inputs = [x]
    in_specs = [pl.BlockSpec((B, T, D), lambda: (0, 0, 0))]
    for layer in range(n_layers):
        for name in (f"w_ih_{layer}", f"w_hh_{layer}", f"b_{layer}"):
            p = params[name]
            inputs.append(p)
            in_specs.append(pl.BlockSpec(p.shape, lambda: (0, 0)))
    for name in ("w_fc", "b_fc"):
        p = params[name]
        inputs.append(p)
        in_specs.append(pl.BlockSpec(p.shape, lambda: (0, 0)))

    kernel = functools.partial(
        _fused_lstm_fc_kernel, T=T, B=B, D=D, H=H, n_layers=n_layers
    )
    out = pl.pallas_call(
        kernel,
        out_shape=jax.ShapeDtypeStruct((B, T * H), jnp.float32),
        in_specs=in_specs,
        out_specs=pl.BlockSpec((B, T * H), lambda: (0, 0)),
    )(*inputs)
    return out.reshape(B, T, H)


# ----------------------------------------------------------------------------
# Pure-JAX reference (lax.scan LSTM) for correctness checking.
# ----------------------------------------------------------------------------
def reference_forward(x, params, n_layers=2):
    h_seq = jnp.transpose(x, (1, 0, 2)).astype(jnp.float32)  # (T, B, D)
    T, B, _ = h_seq.shape
    for layer in range(n_layers):
        w_ih = params[f"w_ih_{layer}"]
        w_hh = params[f"w_hh_{layer}"]
        b = params[f"b_{layer}"]
        H = w_hh.shape[0]

        def step(carry, x_t, w_ih=w_ih, w_hh=w_hh, b=b, H=H):
            h_p, c_p = carry
            gates = x_t @ w_ih + h_p @ w_hh + b
            i_g = jax.nn.sigmoid(gates[:, 0 * H:1 * H])
            f_g = jax.nn.sigmoid(gates[:, 1 * H:2 * H])
            g_g = jnp.tanh(gates[:, 2 * H:3 * H])
            o_g = jax.nn.sigmoid(gates[:, 3 * H:4 * H])
            c = f_g * c_p + i_g * g_g
            h = o_g * jnp.tanh(c)
            return (h, c), h

        init = (jnp.zeros((B, H), jnp.float32), jnp.zeros((B, H), jnp.float32))
        _, h_seq = lax.scan(step, init, h_seq)
    y = jnp.transpose(h_seq, (1, 0, 2))
    return y @ params["w_fc"] + params["b_fc"]


if __name__ == "__main__":
    input_dim, hidden_dim, batch_, seq_len, n_layers = 8, 32, 4, 8, 2

    key = jax.random.PRNGKey(0)
    k_x, k_p = jax.random.split(key)
    x = jax.random.normal(k_x, (batch_, seq_len, input_dim), jnp.float32)
    params = init_params(k_p, input_dim, hidden_dim, n_layers)

    out = my_model_forward(x, params, n_layers=n_layers)
    out = jax.block_until_ready(out)

    ref = reference_forward(x, params, n_layers=n_layers)
    assert out.shape == (batch_, seq_len, hidden_dim)
    np.testing.assert_allclose(np.asarray(out), np.asarray(ref), rtol=1e-5, atol=1e-5)

    print("KERNEL_OK")
</pallas_src>

<mosaic_0001>
module attributes {stable_mosaic.version = 11 : i64} {
  func.func @_fused_lstm_fc_kernel(%arg0: memref<4x8x8xf32, #tpu.memory_space<vmem>>, %arg1: memref<8x128xf32, #tpu.memory_space<vmem>>, %arg2: memref<32x128xf32, #tpu.memory_space<vmem>>, %arg3: memref<1x128xf32, #tpu.memory_space<vmem>>, %arg4: memref<32x128xf32, #tpu.memory_space<vmem>>, %arg5: memref<32x128xf32, #tpu.memory_space<vmem>>, %arg6: memref<1x128xf32, #tpu.memory_space<vmem>>, %arg7: memref<32x32xf32, #tpu.memory_space<vmem>>, %arg8: memref<1x32xf32, #tpu.memory_space<vmem>>, %arg9: memref<4x256xf32, #tpu.memory_space<vmem>>) attributes {dimension_semantics = [], scalar_prefetch = 0 : i64, scratch_operands = 0 : i64, tpu.core_type = #tpu.core_type<tc>} {
    %c0 = arith.constant 0 : index
    %c0_0 = arith.constant 0 : index
    %c0_1 = arith.constant 0 : index
    %0 = vector.load %arg0[%c0, %c0_0, %c0_1] : memref<4x8x8xf32, #tpu.memory_space<vmem>>, vector<4x8x8xf32>
    %1 = vector.extract_strided_slice %0 {offsets = [0, 0, 0], sizes = [4, 1, 8], strides = [1, 1, 1]} : vector<4x8x8xf32> to vector<4x1x8xf32>
    %2 = vector.shape_cast %1 : vector<4x1x8xf32> to vector<4x8xf32>
    %3 = vector.extract_strided_slice %0 {offsets = [0, 1, 0], sizes = [4, 1, 8], strides = [1, 1, 1]} : vector<4x8x8xf32> to vector<4x1x8xf32>
    %4 = vector.shape_cast %3 : vector<4x1x8xf32> to vector<4x8xf32>
    %5 = vector.extract_strided_slice %0 {offsets = [0, 2, 0], sizes = [4, 1, 8], strides = [1, 1, 1]} : vector<4x8x8xf32> to vector<4x1x8xf32>
    %6 = vector.shape_cast %5 : vector<4x1x8xf32> to vector<4x8xf32>
    %7 = vector.extract_strided_slice %0 {offsets = [0, 3, 0], sizes = [4, 1, 8], strides = [1, 1, 1]} : vector<4x8x8xf32> to vector<4x1x8xf32>
    %8 = vector.shape_cast %7 : vector<4x1x8xf32> to vector<4x8xf32>
    %9 = vector.extract_strided_slice %0 {offsets = [0, 4, 0], sizes = [4, 1, 8], strides = [1, 1, 1]} : vector<4x8x8xf32> to vector<4x1x8xf32>
    %10 = vector.shape_cast %9 : vector<4x1x8xf32> to vector<4x8xf32>
    %11 = vector.extract_strided_slice %0 {offsets = [0, 5, 0], sizes = [4, 1, 8], strides = [1, 1, 1]} : vector<4x8x8xf32> to vector<4x1x8xf32>
    %12 = vector.shape_cast %11 : vector<4x1x8xf32> to vector<4x8xf32>
    %13 = vector.extract_strided_slice %0 {offsets = [0, 6, 0], sizes = [4, 1, 8], strides = [1, 1, 1]} : vector<4x8x8xf32> to vector<4x1x8xf32>
    %14 = vector.shape_cast %13 : vector<4x1x8xf32> to vector<4x8xf32>
    %15 = vector.extract_strided_slice %0 {offsets = [0, 7, 0], sizes = [4, 1, 8], strides = [1, 1, 1]} : vector<4x8x8xf32> to vector<4x1x8xf32>
    %16 = vector.shape_cast %15 : vector<4x1x8xf32> to vector<4x8xf32>
    %17 = tpu.concatenate %2, %4, %6, %8, %10, %12, %14, %16 in 0 : vector<4x8xf32>, vector<4x8xf32>, vector<4x8xf32>, vector<4x8xf32>, vector<4x8xf32>, vector<4x8xf32>, vector<4x8xf32>, vector<4x8xf32> -> vector<32x8xf32>
    %c0_2 = arith.constant 0 : index
    %c0_3 = arith.constant 0 : index
    %18 = vector.load %arg1[%c0_2, %c0_3] : memref<8x128xf32, #tpu.memory_space<vmem>>, vector<8x128xf32>
    %c0_4 = arith.constant 0 : index
    %c0_5 = arith.constant 0 : index
    %19 = vector.load %arg2[%c0_4, %c0_5] : memref<32x128xf32, #tpu.memory_space<vmem>>, vector<32x128xf32>
    %c0_6 = arith.constant 0 : index
    %c0_7 = arith.constant 0 : index
    %20 = vector.load %arg3[%c0_6, %c0_7] : memref<1x128xf32, #tpu.memory_space<vmem>>, vector<1x128xf32>
    %cst = arith.constant dense<0.000000e+00> : vector<32x128xf32>
    %21 = tpu.matmul %17, %18, %cst {dimension_numbers = #tpu.dot_dimension_numbers<[1], [0], [0], [1], [0, 0, 1, 1], [], []>} : vector<32x8xf32>, vector<8x128xf32>, vector<32x128xf32> -> vector<32x128xf32>
    %22 = vector.broadcast %20 : vector<1x128xf32> to vector<32x128xf32>
    %23 = arith.addf %21, %22 : vector<32x128xf32>
    %cst_8 = arith.constant 0.000000e+00 : f32
    %24 = vector.broadcast %cst_8 : f32 to vector<4x32xf32>
    %cst_9 = arith.constant 0.000000e+00 : f32
    %25 = vector.broadcast %cst_9 : f32 to vector<4x32xf32>
    %26 = vector.extract_strided_slice %23 {offsets = [0, 0], sizes = [4, 128], strides = [1, 1]} : vector<32x128xf32> to vector<4x128xf32>
    %cst_10 = arith.constant dense<0.000000e+00> : vector<4x128xf32>
    %27 = tpu.matmul %24, %19, %cst_10 {dimension_numbers = #tpu.dot_dimension_numbers<[1], [0], [0], [1], [0, 0, 1, 1], [], []>} : vector<4x32xf32>, vector<32x128xf32>, vector<4x128xf32> -> vector<4x128xf32>
    %28 = arith.addf %26, %27 : vector<4x128xf32>
    %29 = vector.extract_strided_slice %28 {offsets = [0, 0], sizes = [4, 32], strides = [1, 1]} : vector<4x128xf32> to vector<4x32xf32>
    %30 = arith.negf %29 : vector<4x32xf32>
    %31 = math.exp %30 : vector<4x32xf32>
    %cst_11 = arith.constant 1.000000e+00 : f32
    %32 = vector.broadcast %cst_11 : f32 to vector<4x32xf32>
    %33 = arith.addf %32, %31 : vector<4x32xf32>
    %34 = arith.divf %32, %33 : vector<4x32xf32>
    %35 = vector.extract_strided_slice %28 {offsets = [0, 32], sizes = [4, 32], strides = [1, 1]} : vector<4x128xf32> to vector<4x32xf32>
    %36 = arith.negf %35 : vector<4x32xf32>
    %37 = math.exp %36 : vector<4x32xf32>
    %cst_12 = arith.constant 1.000000e+00 : f32
    %38 = vector.broadcast %cst_12 : f32 to vector<4x32xf32>
    %39 = arith.addf %38, %37 : vector<4x32xf32>
    %40 = arith.divf %38, %39 : vector<4x32xf32>
    %41 = vector.extract_strided_slice %28 {offsets = [0, 64], sizes = [4, 32], strides = [1, 1]} : vector<4x128xf32> to vector<4x32xf32>
    %42 = math.tanh %41 : vector<4x32xf32>
    %43 = vector.extract_strided_slice %28 {offsets = [0, 96], sizes = [4, 32], strides = [1, 1]} : vector<4x128xf32> to vector<4x32xf32>
    %44 = arith.negf %43 : vector<4x32xf32>
    %45 = math.exp %44 : vector<4x32xf32>
    %cst_13 = arith.constant 1.000000e+00 : f32
    %46 = vector.broadcast %cst_13 : f32 to vector<4x32xf32>
    %47 = arith.addf %46, %45 : vector<4x32xf32>
    %48 = arith.divf %46, %47 : vector<4x32xf32>
    %49 = arith.mulf %40, %25 : vector<4x32xf32>
    %50 = arith.mulf %34, %42 : vector<4x32xf32>
    %51 = arith.addf %49, %50 : vector<4x32xf32>
    %52 = math.tanh %51 : vector<4x32xf32>
    %53 = arith.mulf %48, %52 : vector<4x32xf32>
    %54 = vector.extract_strided_slice %23 {offsets = [4, 0], sizes = [4, 128], strides = [1, 1]} : vector<32x128xf32> to vector<4x128xf32>
    %cst_14 = arith.constant dense<0.000000e+00> : vector<4x128xf32>
    %55 = tpu.matmul %53, %19, %cst_14 {dimension_numbers = #tpu.dot_dimension_numbers<[1], [0], [0], [1], [0, 0, 1, 1], [], []>} : vector<4x32xf32>, vector<32x128xf32>, vector<4x128xf32> -> vector<4x128xf32>
    %56 = arith.addf %54, %55 : vector<4x128xf32>
    %57 = vector.extract_strided_slice %56 {offsets = [0, 0], sizes = [4, 32], strides = [1, 1]} : vector<4x128xf32> to vector<4x32xf32>
    %58 = arith.negf %57 : vector<4x32xf32>
    %59 = math.exp %58 : vector<4x32xf32>
    %cst_15 = arith.constant 1.000000e+00 : f32
    %60 = vector.broadcast %cst_15 : f32 to vector<4x32xf32>
    %61 = arith.addf %60, %59 : vector<4x32xf32>
    %62 = arith.divf %60, %61 : vector<4x32xf32>
    %63 = vector.extract_strided_slice %56 {offsets = [0, 32], sizes = [4, 32], strides = [1, 1]} : vector<4x128xf32> to vector<4x32xf32>
    %64 = arith.negf %63 : vector<4x32xf32>
    %65 = math.exp %64 : vector<4x32xf32>
    %cst_16 = arith.constant 1.000000e+00 : f32
    %66 = vector.broadcast %cst_16 : f32 to vector<4x32xf32>
    %67 = arith.addf %66, %65 : vector<4x32xf32>
    %68 = arith.divf %66, %67 : vector<4x32xf32>
    %69 = vector.extract_strided_slice %56 {offsets = [0, 64], sizes = [4, 32], strides = [1, 1]} : vector<4x128xf32> to vector<4x32xf32>
    %70 = math.tanh %69 : vector<4x32xf32>
    %71 = vector.extract_strided_slice %56 {offsets = [0, 96], sizes = [4, 32], strides = [1, 1]} : vector<4x128xf32> to vector<4x32xf32>
    %72 = arith.negf %71 : vector<4x32xf32>
    %73 = math.exp %72 : vector<4x32xf32>
    %cst_17 = arith.constant 1.000000e+00 : f32
    %74 = vector.broadcast %cst_17 : f32 to vector<4x32xf32>
    %75 = arith.addf %74, %73 : vector<4x32xf32>
    %76 = arith.divf %74, %75 : vector<4x32xf32>
    %77 = arith.mulf %68, %51 : vector<4x32xf32>
    %78 = arith.mulf %62, %70 : vector<4x32xf32>
    %79 = arith.addf %77, %78 : vector<4x32xf32>
    %80 = math.tanh %79 : vector<4x32xf32>
    %81 = arith.mulf %76, %80 : vector<4x32xf32>
    %82 = vector.extract_strided_slice %23 {offsets = [8, 0], sizes = [4, 128], strides = [1, 1]} : vector<32x128xf32> to vector<4x128xf32>
    %cst_18 = arith.constant dense<0.000000e+00> : vector<4x128xf32>
    %83 = tpu.matmul %81, %19, %cst_18 {dimension_numbers = #tpu.dot_dimension_numbers<[1], [0], [0], [1], [0, 0, 1, 1], [], []>} : vector<4x32xf32>, vector<32x128xf32>, vector<4x128xf32> -> vector<4x128xf32>
    %84 = arith.addf %82, %83 : vector<4x128xf32>
    %85 = vector.extract_strided_slice %84 {offsets = [0, 0], sizes = [4, 32], strides = [1, 1]} : vector<4x128xf32> to vector<4x32xf32>
    %86 = arith.negf %85 : vector<4x32xf32>
    %87 = math.exp %86 : vector<4x32xf32>
    %cst_19 = arith.constant 1.000000e+00 : f32
    %88 = vector.broadcast %cst_19 : f32 to vector<4x32xf32>
    %89 = arith.addf %88, %87 : vector<4x32xf32>
    %90 = arith.divf %88, %89 : vector<4x32xf32>
    %91 = vector.extract_strided_slice %84 {offsets = [0, 32], sizes = [4, 32], strides = [1, 1]} : vector<4x128xf32> to vector<4x32xf32>
    %92 = arith.negf %91 : vector<4x32xf32>
    %93 = math.exp %92 : vector<4x32xf32>
    %cst_20 = arith.constant 1.000000e+00 : f32
    %94 = vector.broadcast %cst_20 : f32 to vector<4x32xf32>
    %95 = arith.addf %94, %93 : vector<4x32xf32>
    %96 = arith.divf %94, %95 : vector<4x32xf32>
    %97 = vector.extract_strided_slice %84 {offsets = [0, 64], sizes = [4, 32], strides = [1, 1]} : vector<4x128xf32> to vector<4x32xf32>
    %98 = math.tanh %97 : vector<4x32xf32>
    %99 = vector.extract_strided_slice %84 {offsets = [0, 96], sizes = [4, 32], strides = [1, 1]} : vector<4x128xf32> to vector<4x32xf32>
    %100 = arith.negf %99 : vector<4x32xf32>
    %101 = math.exp %100 : vector<4x32xf32>
    %cst_21 = arith.constant 1.000000e+00 : f32
    %102 = vector.broadcast %cst_21 : f32 to vector<4x32xf32>
    %103 = arith.addf %102, %101 : vector<4x32xf32>
    %104 = arith.divf %102, %103 : vector<4x32xf32>
    %105 = arith.mulf %96, %79 : vector<4x32xf32>
    %106 = arith.mulf %90, %98 : vector<4x32xf32>
    %107 = arith.addf %105, %106 : vector<4x32xf32>
    %108 = math.tanh %107 : vector<4x32xf32>
    %109 = arith.mulf %104, %108 : vector<4x32xf32>
    %110 = vector.extract_strided_slice %23 {offsets = [12, 0], sizes = [4, 128], strides = [1, 1]} : vector<32x128xf32> to vector<4x128xf32>
    %cst_22 = arith.constant dense<0.000000e+00> : vector<4x128xf32>
    %111 = tpu.matmul %109, %19, %cst_22 {dimension_numbers = #tpu.dot_dimension_numbers<[1], [0], [0], [1], [0, 0, 1, 1], [], []>} : vector<4x32xf32>, vector<32x128xf32>, vector<4x128xf32> -> vector<4x128xf32>
    %112 = arith.addf %110, %111 : vector<4x128xf32>
    %113 = vector.extract_strided_slice %112 {offsets = [0, 0], sizes = [4, 32], strides = [1, 1]} : vector<4x128xf32> to vector<4x32xf32>
    %114 = arith.negf %113 : vector<4x32xf32>
    %115 = math.exp %114 : vector<4x32xf32>
    %cst_23 = arith.constant 1.000000e+00 : f32
    %116 = vector.broadcast %cst_23 : f32 to vector<4x32xf32>
    %117 = arith.addf %116, %115 : vector<4x32xf32>
    %118 = arith.divf %116, %117 : vector<4x32xf32>
    %119 = vector.extract_strided_slice %112 {offsets = [0, 32], sizes = [4, 32], strides = [1, 1]} : vector<4x128xf32> to vector<4x32xf32>
    %120 = arith.negf %119 : vector<4x32xf32>
    %121 = math.exp %120 : vector<4x32xf32>
    %cst_24 = arith.constant 1.000000e+00 : f32
    %122 = vector.broadcast %cst_24 : f32 to vector<4x32xf32>
    %123 = arith.addf %122, %121 : vector<4x32xf32>
    %124 = arith.divf %122, %123 : vector<4x32xf32>
    %125 = vector.extract_strided_slice %112 {offsets = [0, 64], sizes = [4, 32], strides = [1, 1]} : vector<4x128xf32> to vector<4x32xf32>
    %126 = math.tanh %125 : vector<4x32xf32>
    %127 = vector.extract_strided_slice %112 {offsets = [0, 96], sizes = [4, 32], strides = [1, 1]} : vector<4x128xf32> to vector<4x32xf32>
    %128 = arith.negf %127 : vector<4x32xf32>
    %129 = math.exp %128 : vector<4x32xf32>
    %cst_25 = arith.constant 1.000000e+00 : f32
    %130 = vector.broadcast %cst_25 : f32 to vector<4x32xf32>
    %131 = arith.addf %130, %129 : vector<4x32xf32>
    %132 = arith.divf %130, %131 : vector<4x32xf32>
    %133 = arith.mulf %124, %107 : vector<4x32xf32>
    %134 = arith.mulf %118, %126 : vector<4x32xf32>
    %135 = arith.addf %133, %134 : vector<4x32xf32>
    %136 = math.tanh %135 : vector<4x32xf32>
    %137 = arith.mulf %132, %136 : vector<4x32xf32>
    %138 = vector.extract_strided_slice %23 {offsets = [16, 0], sizes = [4, 128], strides = [1, 1]} : vector<32x128xf32> to vector<4x128xf32>
    %cst_26 = arith.constant dense<0.000000e+00> : vector<4x128xf32>
    %139 = tpu.matmul %137, %19, %cst_26 {dimension_numbers = #tpu.dot_dimension_numbers<[1], [0], [0], [1], [0, 0, 1, 1], [], []>} : vector<4x32xf32>, vector<32x128xf32>, vector<4x128xf32> -> vector<4x128xf32>
    %140 = arith.addf %138, %139 : vector<4x128xf32>
    %141 = vector.extract_strided_slice %140 {offsets = [0, 0], sizes = [4, 32], strides = [1, 1]} : vector<4x128xf32> to vector<4x32xf32>
    %142 = arith.negf %141 : vector<4x32xf32>
    %143 = math.exp %142 : vector<4x32xf32>
    %cst_27 = arith.constant 1.000000e+00 : f32
    %144 = vector.broadcast %cst_27 : f32 to vector<4x32xf32>
    %145 = arith.addf %144, %143 : vector<4x32xf32>
    %146 = arith.divf %144, %145 : vector<4x32xf32>
    %147 = vector.extract_strided_slice %140 {offsets = [0, 32], sizes = [4, 32], strides = [1, 1]} : vector<4x128xf32> to vector<4x32xf32>
    %148 = arith.negf %147 : vector<4x32xf32>
    %149 = math.exp %148 : vector<4x32xf32>
    %cst_28 = arith.constant 1.000000e+00 : f32
    %150 = vector.broadcast %cst_28 : f32 to vector<4x32xf32>
    %151 = arith.addf %150, %149 : vector<4x32xf32>
    %152 = arith.divf %150, %151 : vector<4x32xf32>
    %153 = vector.extract_strided_slice %140 {offsets = [0, 64], sizes = [4, 32], strides = [1, 1]} : vector<4x128xf32> to vector<4x32xf32>
    %154 = math.tanh %153 : vector<4x32xf32>
    %155 = vector.extract_strided_slice %140 {offsets = [0, 96], sizes = [4, 32], strides = [1, 1]} : vector<4x128xf32> to vector<4x32xf32>
    %156 = arith.negf %155 : vector<4x32xf32>
    %157 = math.exp %156 : vector<4x32xf32>
    %cst_29 = arith.constant 1.000000e+00 : f32
    %158 = vector.broadcast %cst_29 : f32 to vector<4x32xf32>
    %159 = arith.addf %158, %157 : vector<4x32xf32>
    %160 = arith.divf %158, %159 : vector<4x32xf32>
    %161 = arith.mulf %152, %135 : vector<4x32xf32>
    %162 = arith.mulf %146, %154 : vector<4x32xf32>
    %163 = arith.addf %161, %162 : vector<4x32xf32>
    %164 = math.tanh %163 : vector<4x32xf32>
    %165 = arith.mulf %160, %164 : vector<4x32xf32>
    %166 = vector.extract_strided_slice %23 {offsets = [20, 0], sizes = [4, 128], strides = [1, 1]} : vector<32x128xf32> to vector<4x128xf32>
    %cst_30 = arith.constant dense<0.000000e+00> : vector<4x128xf32>
    %167 = tpu.matmul %165, %19, %cst_30 {dimension_numbers = #tpu.dot_dimension_numbers<[1], [0], [0], [1], [0, 0, 1, 1], [], []>} : vector<4x32xf32>, vector<32x128xf32>, vector<4x128xf32> -> vector<4x128xf32>
    %168 = arith.addf %166, %167 : vector<4x128xf32>
    %169 = vector.extract_strided_slice %168 {offsets = [0, 0], sizes = [4, 32], strides = [1, 1]} : vector<4x128xf32> to vector<4x32xf32>
    %170 = arith.negf %169 : vector<4x32xf32>
    %171 = math.exp %170 : vector<4x32xf32>
    %cst_31 = arith.constant 1.000000e+00 : f32
    %172 = vector.broadcast %cst_31 : f32 to vector<4x32xf32>
    %173 = arith.addf %172, %171 : vector<4x32xf32>
    %174 = arith.divf %172, %173 : vector<4x32xf32>
    %175 = vector.extract_strided_slice %168 {offsets = [0, 32], sizes = [4, 32], strides = [1, 1]} : vector<4x128xf32> to vector<4x32xf32>
    %176 = arith.negf %175 : vector<4x32xf32>
    %177 = math.exp %176 : vector<4x32xf32>
    %cst_32 = arith.constant 1.000000e+00 : f32
    %178 = vector.broadcast %cst_32 : f32 to vector<4x32xf32>
    %179 = arith.addf %178, %177 : vector<4x32xf32>
    %180 = arith.divf %178, %179 : vector<4x32xf32>
    %181 = vector.extract_strided_slice %168 {offsets = [0, 64], sizes = [4, 32], strides = [1, 1]} : vector<4x128xf32> to vector<4x32xf32>
    %182 = math.tanh %181 : vector<4x32xf32>
    %183 = vector.extract_strided_slice %168 {offsets = [0, 96], sizes = [4, 32], strides = [1, 1]} : vector<4x128xf32> to vector<4x32xf32>
    %184 = arith.negf %183 : vector<4x32xf32>
    %185 = math.exp %184 : vector<4x32xf32>
    %cst_33 = arith.constant 1.000000e+00 : f32
    %186 = vector.broadcast %cst_33 : f32 to vector<4x32xf32>
    %187 = arith.addf %186, %185 : vector<4x32xf32>
    %188 = arith.divf %186, %187 : vector<4x32xf32>
    %189 = arith.mulf %180, %163 : vector<4x32xf32>
    %190 = arith.mulf %174, %182 : vector<4x32xf32>
    %191 = arith.addf %189, %190 : vector<4x32xf32>
    %192 = math.tanh %191 : vector<4x32xf32>
    %193 = arith.mulf %188, %192 : vector<4x32xf32>
    %194 = vector.extract_strided_slice %23 {offsets = [24, 0], sizes = [4, 128], strides = [1, 1]} : vector<32x128xf32> to vector<4x128xf32>
    %cst_34 = arith.constant dense<0.000000e+00> : vector<4x128xf32>
    %195 = tpu.matmul %193, %19, %cst_34 {dimension_numbers = #tpu.dot_dimension_numbers<[1], [0], [0], [1], [0, 0, 1, 1], [], []>} : vector<4x32xf32>, vector<32x128xf32>, vector<4x128xf32> -> vector<4x128xf32>
    %196 = arith.addf %194, %195 : vector<4x128xf32>
    %197 = vector.extract_strided_slice %196 {offsets = [0, 0], sizes = [4, 32], strides = [1, 1]} : vector<4x128xf32> to vector<4x32xf32>
    %198 = arith.negf %197 : vector<4x32xf32>
    %199 = math.exp %198 : vector<4x32xf32>
    %cst_35 = arith.constant 1.000000e+00 : f32
    %200 = vector.broadcast %cst_35 : f32 to vector<4x32xf32>
    %201 = arith.addf %200, %199 : vector<4x32xf32>
    %202 = arith.divf %200, %201 : vector<4x32xf32>
    %203 = vector.extract_strided_slice %196 {offsets = [0, 32], sizes = [4, 32], strides = [1, 1]} : vector<4x128xf32> to vector<4x32xf32>
    %204 = arith.negf %203 : vector<4x32xf32>
    %205 = math.exp %204 : vector<4x32xf32>
    %cst_36 = arith.constant 1.000000e+00 : f32
    %206 = vector.broadcast %cst_36 : f32 to vector<4x32xf32>
    %207 = arith.addf %206, %205 : vector<4x32xf32>
    %208 = arith.divf %206, %207 : vector<4x32xf32>
    %209 = vector.extract_strided_slice %196 {offsets = [0, 64], sizes = [4, 32], strides = [1, 1]} : vector<4x128xf32> to vector<4x32xf32>
    %210 = math.tanh %209 : vector<4x32xf32>
    %211 = vector.extract_strided_slice %196 {offsets = [0, 96], sizes = [4, 32], strides = [1, 1]} : vector<4x128xf32> to vector<4x32xf32>
    %212 = arith.negf %211 : vector<4x32xf32>
    %213 = math.exp %212 : vector<4x32xf32>
    %cst_37 = arith.constant 1.000000e+00 : f32
    %214 = vector.broadcast %cst_37 : f32 to vector<4x32xf32>
    %215 = arith.addf %214, %213 : vector<4x32xf32>
    %216 = arith.divf %214, %215 : vector<4x32xf32>
    %217 = arith.mulf %208, %191 : vector<4x32xf32>
    %218 = arith.mulf %202, %210 : vector<4x32xf32>
    %219 = arith.addf %217, %218 : vector<4x32xf32>
    %220 = math.tanh %219 : vector<4x32xf32>
    %221 = arith.mulf %216, %220 : vector<4x32xf32>
    %222 = vector.extract_strided_slice %23 {offsets = [28, 0], sizes = [4, 128], strides = [1, 1]} : vector<32x128xf32> to vector<4x128xf32>
    %cst_38 = arith.constant dense<0.000000e+00> : vector<4x128xf32>
    %223 = tpu.matmul %221, %19, %cst_38 {dimension_numbers = #tpu.dot_dimension_numbers<[1], [0], [0], [1], [0, 0, 1, 1], [], []>} : vector<4x32xf32>, vector<32x128xf32>, vector<4x128xf32> -> vector<4x128xf32>
    %224 = arith.addf %222, %223 : vector<4x128xf32>
    %225 = vector.extract_strided_slice %224 {offsets = [0, 0], sizes = [4, 32], strides = [1, 1]} : vector<4x128xf32> to vector<4x32xf32>
    %226 = arith.negf %225 : vector<4x32xf32>
    %227 = math.exp %226 : vector<4x32xf32>
    %cst_39 = arith.constant 1.000000e+00 : f32
    %228 = vector.broadcast %cst_39 : f32 to vector<4x32xf32>
    %229 = arith.addf %228, %227 : vector<4x32xf32>
    %230 = arith.divf %228, %229 : vector<4x32xf32>
    %231 = vector.extract_strided_slice %224 {offsets = [0, 32], sizes = [4, 32], strides = [1, 1]} : vector<4x128xf32> to vector<4x32xf32>
    %232 = arith.negf %231 : vector<4x32xf32>
    %233 = math.exp %232 : vector<4x32xf32>
    %cst_40 = arith.constant 1.000000e+00 : f32
    %234 = vector.broadcast %cst_40 : f32 to vector<4x32xf32>
    %235 = arith.addf %234, %233 : vector<4x32xf32>
    %236 = arith.divf %234, %235 : vector<4x32xf32>
    %237 = vector.extract_strided_slice %224 {offsets = [0, 64], sizes = [4, 32], strides = [1, 1]} : vector<4x128xf32> to vector<4x32xf32>
    %238 = math.tanh %237 : vector<4x32xf32>
    %239 = vector.extract_strided_slice %224 {offsets = [0, 96], sizes = [4, 32], strides = [1, 1]} : vector<4x128xf32> to vector<4x32xf32>
    %240 = arith.negf %239 : vector<4x32xf32>
    %241 = math.exp %240 : vector<4x32xf32>
    %cst_41 = arith.constant 1.000000e+00 : f32
    %242 = vector.broadcast %cst_41 : f32 to vector<4x32xf32>
    %243 = arith.addf %242, %241 : vector<4x32xf32>
    %244 = arith.divf %242, %243 : vector<4x32xf32>
    %245 = arith.mulf %236, %219 : vector<4x32xf32>
    %246 = arith.mulf %230, %238 : vector<4x32xf32>
    %247 = arith.addf %245, %246 : vector<4x32xf32>
    %248 = math.tanh %247 : vector<4x32xf32>
    %249 = arith.mulf %244, %248 : vector<4x32xf32>
    %250 = tpu.concatenate %53, %81, %109, %137, %165, %193, %221, %249 in 0 : vector<4x32xf32>, vector<4x32xf32>, vector<4x32xf32>, vector<4x32xf32>, vector<4x32xf32>, vector<4x32xf32>, vector<4x32xf32>, vector<4x32xf32> -> vector<32x32xf32>
    %c0_42 = arith.constant 0 : index
    %c0_43 = arith.constant 0 : index
    %251 = vector.load %arg4[%c0_42, %c0_43] : memref<32x128xf32, #tpu.memory_space<vmem>>, vector<32x128xf32>
    %c0_44 = arith.constant 0 : index
    %c0_45 = arith.constant 0 : index
    %252 = vector.load %arg5[%c0_44, %c0_45] : memref<32x128xf32, #tpu.memory_space<vmem>>, vector<32x128xf32>
    %c0_46 = arith.constant 0 : index
    %c0_47 = arith.constant 0 : index
    %253 = vector.load %arg6[%c0_46, %c0_47] : memref<1x128xf32, #tpu.memory_space<vmem>>, vector<1x128xf32>
    %cst_48 = arith.constant dense<0.000000e+00> : vector<32x128xf32>
    %254 = tpu.matmul %250, %251, %cst_48 {dimension_numbers = #tpu.dot_dimension_numbers<[1], [0], [0], [1], [0, 0, 1, 1], [], []>} : vector<32x32xf32>, vector<32x128xf32>, vector<32x128xf32> -> vector<32x128xf32>
    %255 = vector.broadcast %253 : vector<1x128xf32> to vector<32x128xf32>
    %256 = arith.addf %254, %255 : vector<32x128xf32>
    %cst_49 = arith.constant 0.000000e+00 : f32
    %257 = vector.broadcast %cst_49 : f32 to vector<4x32xf32>
    %cst_50 = arith.constant 0.000000e+00 : f32
    %258 = vector.broadcast %cst_50 : f32 to vector<4x32xf32>
    %259 = vector.extract_strided_slice %256 {offsets = [0, 0], sizes = [4, 128], strides = [1, 1]} : vector<32x128xf32> to vector<4x128xf32>
    %cst_51 = arith.constant dense<0.000000e+00> : vector<4x128xf32>
    %260 = tpu.matmul %257, %252, %cst_51 {dimension_numbers = #tpu.dot_dimension_numbers<[1], [0], [0], [1], [0, 0, 1, 1], [], []>} : vector<4x32xf32>, vector<32x128xf32>, vector<4x128xf32> -> vector<4x128xf32>
    %261 = arith.addf %259, %260 : vector<4x128xf32>
    %262 = vector.extract_strided_slice %261 {offsets = [0, 0], sizes = [4, 32], strides = [1, 1]} : vector<4x128xf32> to vector<4x32xf32>
    %263 = arith.negf %262 : vector<4x32xf32>
    %264 = math.exp %263 : vector<4x32xf32>
    %cst_52 = arith.constant 1.000000e+00 : f32
    %265 = vector.broadcast %cst_52 : f32 to vector<4x32xf32>
    %266 = arith.addf %265, %264 : vector<4x32xf32>
    %267 = arith.divf %265, %266 : vector<4x32xf32>
    %268 = vector.extract_strided_slice %261 {offsets = [0, 32], sizes = [4, 32], strides = [1, 1]} : vector<4x128xf32> to vector<4x32xf32>
    %269 = arith.negf %268 : vector<4x32xf32>
    %270 = math.exp %269 : vector<4x32xf32>
    %cst_53 = arith.constant 1.000000e+00 : f32
    %271 = vector.broadcast %cst_53 : f32 to vector<4x32xf32>
    %272 = arith.addf %271, %270 : vector<4x32xf32>
    %273 = arith.divf %271, %272 : vector<4x32xf32>
    %274 = vector.extract_strided_slice %261 {offsets = [0, 64], sizes = [4, 32], strides = [1, 1]} : vector<4x128xf32> to vector<4x32xf32>
    %275 = math.tanh %274 : vector<4x32xf32>
    %276 = vector.extract_strided_slice %261 {offsets = [0, 96], sizes = [4, 32], strides = [1, 1]} : vector<4x128xf32> to vector<4x32xf32>
    %277 = arith.negf %276 : vector<4x32xf32>
    %278 = math.exp %277 : vector<4x32xf32>
    %cst_54 = arith.constant 1.000000e+00 : f32
    %279 = vector.broadcast %cst_54 : f32 to vector<4x32xf32>
    %280 = arith.addf %279, %278 : vector<4x32xf32>
    %281 = arith.divf %279, %280 : vector<4x32xf32>
    %282 = arith.mulf %273, %258 : vector<4x32xf32>
    %283 = arith.mulf %267, %275 : vector<4x32xf32>
    %284 = arith.addf %282, %283 : vector<4x32xf32>
    %285 = math.tanh %284 : vector<4x32xf32>
    %286 = arith.mulf %281, %285 : vector<4x32xf32>
    %287 = vector.extract_strided_slice %256 {offsets = [4, 0], sizes = [4, 128], strides = [1, 1]} : vector<32x128xf32> to vector<4x128xf32>
    %cst_55 = arith.constant dense<0.000000e+00> : vector<4x128xf32>
    %288 = tpu.matmul %286, %252, %cst_55 {dimension_numbers = #tpu.dot_dimension_numbers<[1], [0], [0], [1], [0, 0, 1, 1], [], []>} : vector<4x32xf32>, vector<32x128xf32>, vector<4x128xf32> -> vector<4x128xf32>
    %289 = arith.addf %287, %288 : vector<4x128xf32>
    %290 = vector.extract_strided_slice %289 {offsets = [0, 0], sizes = [4, 32], strides = [1, 1]} : vector<4x128xf32> to vector<4x32xf32>
    %291 = arith.negf %290 : vector<4x32xf32>
    %292 = math.exp %291 : vector<4x32xf32>
    %cst_56 = arith.constant 1.000000e+00 : f32
    %293 = vector.broadcast %cst_56 : f32 to vector<4x32xf32>
    %294 = arith.addf %293, %292 : vector<4x32xf32>
    %295 = arith.divf %293, %294 : vector<4x32xf32>
    %296 = vector.extract_strided_slice %289 {offsets = [0, 32], sizes = [4, 32], strides = [1, 1]} : vector<4x128xf32> to vector<4x32xf32>
    %297 = arith.negf %296 : vector<4x32xf32>
    %298 = math.exp %297 : vector<4x32xf32>
    %cst_57 = arith.constant 1.000000e+00 : f32
    %299 = vector.broadcast %cst_57 : f32 to vector<4x32xf32>
    %300 = arith.addf %299, %298 : vector<4x32xf32>
    %301 = arith.divf %299, %300 : vector<4x32xf32>
    %302 = vector.extract_strided_slice %289 {offsets = [0, 64], sizes = [4, 32], strides = [1, 1]} : vector<4x128xf32> to vector<4x32xf32>
    %303 = math.tanh %302 : vector<4x32xf32>
    %304 = vector.extract_strided_slice %289 {offsets = [0, 96], sizes = [4, 32], strides = [1, 1]} : vector<4x128xf32> to vector<4x32xf32>
    %305 = arith.negf %304 : vector<4x32xf32>
    %306 = math.exp %305 : vector<4x32xf32>
    %cst_58 = arith.constant 1.000000e+00 : f32
    %307 = vector.broadcast %cst_58 : f32 to vector<4x32xf32>
    %308 = arith.addf %307, %306 : vector<4x32xf32>
    %309 = arith.divf %307, %308 : vector<4x32xf32>
    %310 = arith.mulf %301, %284 : vector<4x32xf32>
    %311 = arith.mulf %295, %303 : vector<4x32xf32>
    %312 = arith.addf %310, %311 : vector<4x32xf32>
    %313 = math.tanh %312 : vector<4x32xf32>
    %314 = arith.mulf %309, %313 : vector<4x32xf32>
    %315 = vector.extract_strided_slice %256 {offsets = [8, 0], sizes = [4, 128], strides = [1, 1]} : vector<32x128xf32> to vector<4x128xf32>
    %cst_59 = arith.constant dense<0.000000e+00> : vector<4x128xf32>
    %316 = tpu.matmul %314, %252, %cst_59 {dimension_numbers = #tpu.dot_dimension_numbers<[1], [0], [0], [1], [0, 0, 1, 1], [], []>} : vector<4x32xf32>, vector<32x128xf32>, vector<4x128xf32> -> vector<4x128xf32>
    %317 = arith.addf %315, %316 : vector<4x128xf32>
    %318 = vector.extract_strided_slice %317 {offsets = [0, 0], sizes = [4, 32], strides = [1, 1]} : vector<4x128xf32> to vector<4x32xf32>
    %319 = arith.negf %318 : vector<4x32xf32>
    %320 = math.exp %319 : vector<4x32xf32>
    %cst_60 = arith.constant 1.000000e+00 : f32
    %321 = vector.broadcast %cst_60 : f32 to vector<4x32xf32>
    %322 = arith.addf %321, %320 : vector<4x32xf32>
    %323 = arith.divf %321, %322 : vector<4x32xf32>
    %324 = vector.extract_strided_slice %317 {offsets = [0, 32], sizes = [4, 32], strides = [1, 1]} : vector<4x128xf32> to vector<4x32xf32>
    %325 = arith.negf %324 : vector<4x32xf32>
    %326 = math.exp %325 : vector<4x32xf32>
    %cst_61 = arith.constant 1.000000e+00 : f32
    %327 = vector.broadcast %cst_61 : f32 to vector<4x32xf32>
    %328 = arith.addf %327, %326 : vector<4x32xf32>
    %329 = arith.divf %327, %328 : vector<4x32xf32>
    %330 = vector.extract_strided_slice %317 {offsets = [0, 64], sizes = [4, 32], strides = [1, 1]} : vector<4x128xf32> to vector<4x32xf32>
    %331 = math.tanh %330 : vector<4x32xf32>
    %332 = vector.extract_strided_slice %317 {offsets = [0, 96], sizes = [4, 32], strides = [1, 1]} : vector<4x128xf32> to vector<4x32xf32>
    %333 = arith.negf %332 : vector<4x32xf32>
    %334 = math.exp %333 : vector<4x32xf32>
    %cst_62 = arith.constant 1.000000e+00 : f32
    %335 = vector.broadcast %cst_62 : f32 to vector<4x32xf32>
    %336 = arith.addf %335, %334 : vector<4x32xf32>
    %337 = arith.divf %335, %336 : vector<4x32xf32>
    %338 = arith.mulf %329, %312 : vector<4x32xf32>
    %339 = arith.mulf %323, %331 : vector<4x32xf32>
    %340 = arith.addf %338, %339 : vector<4x32xf32>
    %341 = math.tanh %340 : vector<4x32xf32>
    %342 = arith.mulf %337, %341 : vector<4x32xf32>
    %343 = vector.extract_strided_slice %256 {offsets = [12, 0], sizes = [4, 128], strides = [1, 1]} : vector<32x128xf32> to vector<4x128xf32>
    %cst_63 = arith.constant dense<0.000000e+00> : vector<4x128xf32>
    %344 = tpu.matmul %342, %252, %cst_63 {dimension_numbers = #tpu.dot_dimension_numbers<[1], [0], [0], [1], [0, 0, 1, 1], [], []>} : vector<4x32xf32>, vector<32x128xf32>, vector<4x128xf32> -> vector<4x128xf32>
    %345 = arith.addf %343, %344 : vector<4x128xf32>
    %346 = vector.extract_strided_slice %345 {offsets = [0, 0], sizes = [4, 32], strides = [1, 1]} : vector<4x128xf32> to vector<4x32xf32>
    %347 = arith.negf %346 : vector<4x32xf32>
    %348 = math.exp %347 : vector<4x32xf32>
    %cst_64 = arith.constant 1.000000e+00 : f32
    %349 = vector.broadcast %cst_64 : f32 to vector<4x32xf32>
    %350 = arith.addf %349, %348 : vector<4x32xf32>
    %351 = arith.divf %349, %350 : vector<4x32xf32>
    %352 = vector.extract_strided_slice %345 {offsets = [0, 32], sizes = [4, 32], strides = [1, 1]} : vector<4x128xf32> to vector<4x32xf32>
    %353 = arith.negf %352 : vector<4x32xf32>
    %354 = math.exp %353 : vector<4x32xf32>
    %cst_65 = arith.constant 1.000000e+00 : f32
    %355 = vector.broadcast %cst_65 : f32 to vector<4x32xf32>
    %356 = arith.addf %355, %354 : vector<4x32xf32>
    %357 = arith.divf %355, %356 : vector<4x32xf32>
    %358 = vector.extract_strided_slice %345 {offsets = [0, 64], sizes = [4, 32], strides = [1, 1]} : vector<4x128xf32> to vector<4x32xf32>
    %359 = math.tanh %358 : vector<4x32xf32>
    %360 = vector.extract_strided_slice %345 {offsets = [0, 96], sizes = [4, 32], strides = [1, 1]} : vector<4x128xf32> to vector<4x32xf32>
    %361 = arith.negf %360 : vector<4x32xf32>
    %362 = math.exp %361 : vector<4x32xf32>
    %cst_66 = arith.constant 1.000000e+00 : f32
    %363 = vector.broadcast %cst_66 : f32 to vector<4x32xf32>
    %364 = arith.addf %363, %362 : vector<4x32xf32>
    %365 = arith.divf %363, %364 : vector<4x32xf32>
    %366 = arith.mulf %357, %340 : vector<4x32xf32>
    %367 = arith.mulf %351, %359 : vector<4x32xf32>
    %368 = arith.addf %366, %367 : vector<4x32xf32>
    %369 = math.tanh %368 : vector<4x32xf32>
    %370 = arith.mulf %365, %369 : vector<4x32xf32>
    %371 = vector.extract_strided_slice %256 {offsets = [16, 0], sizes = [4, 128], strides = [1, 1]} : vector<32x128xf32> to vector<4x128xf32>
    %cst_67 = arith.constant dense<0.000000e+00> : vector<4x128xf32>
    %372 = tpu.matmul %370, %252, %cst_67 {dimension_numbers = #tpu.dot_dimension_numbers<[1], [0], [0], [1], [0, 0, 1, 1], [], []>} : vector<4x32xf32>, vector<32x128xf32>, vector<4x128xf32> -> vector<4x128xf32>
    %373 = arith.addf %371, %372 : vector<4x128xf32>
    %374 = vector.extract_strided_slice %373 {offsets = [0, 0], sizes = [4, 32], strides = [1, 1]} : vector<4x128xf32> to vector<4x32xf32>
    %375 = arith.negf %374 : vector<4x32xf32>
    %376 = math.exp %375 : vector<4x32xf32>
    %cst_68 = arith.constant 1.000000e+00 : f32
    %377 = vector.broadcast %cst_68 : f32 to vector<4x32xf32>
    %378 = arith.addf %377, %376 : vector<4x32xf32>
    %379 = arith.divf %377, %378 : vector<4x32xf32>
    %380 = vector.extract_strided_slice %373 {offsets = [0, 32], sizes = [4, 32], strides = [1, 1]} : vector<4x128xf32> to vector<4x32xf32>
    %381 = arith.negf %380 : vector<4x32xf32>
    %382 = math.exp %381 : vector<4x32xf32>
    %cst_69 = arith.constant 1.000000e+00 : f32
    %383 = vector.broadcast %cst_69 : f32 to vector<4x32xf32>
    %384 = arith.addf %383, %382 : vector<4x32xf32>
    %385 = arith.divf %383, %384 : vector<4x32xf32>
    %386 = vector.extract_strided_slice %373 {offsets = [0, 64], sizes = [4, 32], strides = [1, 1]} : vector<4x128xf32> to vector<4x32xf32>
    %387 = math.tanh %386 : vector<4x32xf32>
    %388 = vector.extract_strided_slice %373 {offsets = [0, 96], sizes = [4, 32], strides = [1, 1]} : vector<4x128xf32> to vector<4x32xf32>
    %389 = arith.negf %388 : vector<4x32xf32>
    %390 = math.exp %389 : vector<4x32xf32>
    %cst_70 = arith.constant 1.000000e+00 : f32
    %391 = vector.broadcast %cst_70 : f32 to vector<4x32xf32>
    %392 = arith.addf %391, %390 : vector<4x32xf32>
    %393 = arith.divf %391, %392 : vector<4x32xf32>
    %394 = arith.mulf %385, %368 : vector<4x32xf32>
    %395 = arith.mulf %379, %387 : vector<4x32xf32>
    %396 = arith.addf %394, %395 : vector<4x32xf32>
    %397 = math.tanh %396 : vector<4x32xf32>
    %398 = arith.mulf %393, %397 : vector<4x32xf32>
    %399 = vector.extract_strided_slice %256 {offsets = [20, 0], sizes = [4, 128], strides = [1, 1]} : vector<32x128xf32> to vector<4x128xf32>
    %cst_71 = arith.constant dense<0.000000e+00> : vector<4x128xf32>
    %400 = tpu.matmul %398, %252, %cst_71 {dimension_numbers = #tpu.dot_dimension_numbers<[1], [0], [0], [1], [0, 0, 1, 1], [], []>} : vector<4x32xf32>, vector<32x128xf32>, vector<4x128xf32> -> vector<4x128xf32>
    %401 = arith.addf %399, %400 : vector<4x128xf32>
    %402 = vector.extract_strided_slice %401 {offsets = [0, 0], sizes = [4, 32], strides = [1, 1]} : vector<4x128xf32> to vector<4x32xf32>
    %403 = arith.negf %402 : vector<4x32xf32>
    %404 = math.exp %403 : vector<4x32xf32>
    %cst_72 = arith.constant 1.000000e+00 : f32
    %405 = vector.broadcast %cst_72 : f32 to vector<4x32xf32>
    %406 = arith.addf %405, %404 : vector<4x32xf32>
    %407 = arith.divf %405, %406 : vector<4x32xf32>
    %408 = vector.extract_strided_slice %401 {offsets = [0, 32], sizes = [4, 32], strides = [1, 1]} : vector<4x128xf32> to vector<4x32xf32>
    %409 = arith.negf %408 : vector<4x32xf32>
    %410 = math.exp %409 : vector<4x32xf32>
    %cst_73 = arith.constant 1.000000e+00 : f32
    %411 = vector.broadcast %cst_73 : f32 to vector<4x32xf32>
    %412 = arith.addf %411, %410 : vector<4x32xf32>
    %413 = arith.divf %411, %412 : vector<4x32xf32>
    %414 = vector.extract_strided_slice %401 {offsets = [0, 64], sizes = [4, 32], strides = [1, 1]} : vector<4x128xf32> to vector<4x32xf32>
    %415 = math.tanh %414 : vector<4x32xf32>
    %416 = vector.extract_strided_slice %401 {offsets = [0, 96], sizes = [4, 32], strides = [1, 1]} : vector<4x128xf32> to vector<4x32xf32>
    %417 = arith.negf %416 : vector<4x32xf32>
    %418 = math.exp %417 : vector<4x32xf32>
    %cst_74 = arith.constant 1.000000e+00 : f32
    %419 = vector.broadcast %cst_74 : f32 to vector<4x32xf32>
    %420 = arith.addf %419, %418 : vector<4x32xf32>
    %421 = arith.divf %419, %420 : vector<4x32xf32>
    %422 = arith.mulf %413, %396 : vector<4x32xf32>
    %423 = arith.mulf %407, %415 : vector<4x32xf32>
    %424 = arith.addf %422, %423 : vector<4x32xf32>
    %425 = math.tanh %424 : vector<4x32xf32>
    %426 = arith.mulf %421, %425 : vector<4x32xf32>
    %427 = vector.extract_strided_slice %256 {offsets = [24, 0], sizes = [4, 128], strides = [1, 1]} : vector<32x128xf32> to vector<4x128xf32>
    %cst_75 = arith.constant dense<0.000000e+00> : vector<4x128xf32>
    %428 = tpu.matmul %426, %252, %cst_75 {dimension_numbers = #tpu.dot_dimension_numbers<[1], [0], [0], [1], [0, 0, 1, 1], [], []>} : vector<4x32xf32>, vector<32x128xf32>, vector<4x128xf32> -> vector<4x128xf32>
    %429 = arith.addf %427, %428 : vector<4x128xf32>
    %430 = vector.extract_strided_slice %429 {offsets = [0, 0], sizes = [4, 32], strides = [1, 1]} : vector<4x128xf32> to vector<4x32xf32>
    %431 = arith.negf %430 : vector<4x32xf32>
    %432 = math.exp %431 : vector<4x32xf32>
    %cst_76 = arith.constant 1.000000e+00 : f32
    %433 = vector.broadcast %cst_76 : f32 to vector<4x32xf32>
    %434 = arith.addf %433, %432 : vector<4x32xf32>
    %435 = arith.divf %433, %434 : vector<4x32xf32>
    %436 = vector.extract_strided_slice %429 {offsets = [0, 32], sizes = [4, 32], strides = [1, 1]} : vector<4x128xf32> to vector<4x32xf32>
    %437 = arith.negf %436 : vector<4x32xf32>
    %438 = math.exp %437 : vector<4x32xf32>
    %cst_77 = arith.constant 1.000000e+00 : f32
    %439 = vector.broadcast %cst_77 : f32 to vector<4x32xf32>
    %440 = arith.addf %439, %438 : vector<4x32xf32>
    %441 = arith.divf %439, %440 : vector<4x32xf32>
    %442 = vector.extract_strided_slice %429 {offsets = [0, 64], sizes = [4, 32], strides = [1, 1]} : vector<4x128xf32> to vector<4x32xf32>
    %443 = math.tanh %442 : vector<4x32xf32>
    %444 = vector.extract_strided_slice %429 {offsets = [0, 96], sizes = [4, 32], strides = [1, 1]} : vector<4x128xf32> to vector<4x32xf32>
    %445 = arith.negf %444 : vector<4x32xf32>
    %446 = math.exp %445 : vector<4x32xf32>
    %cst_78 = arith.constant 1.000000e+00 : f32
    %447 = vector.broadcast %cst_78 : f32 to vector<4x32xf32>
    %448 = arith.addf %447, %446 : vector<4x32xf32>
    %449 = arith.divf %447, %448 : vector<4x32xf32>
    %450 = arith.mulf %441, %424 : vector<4x32xf32>
    %451 = arith.mulf %435, %443 : vector<4x32xf32>
    %452 = arith.addf %450, %451 : vector<4x32xf32>
    %453 = math.tanh %452 : vector<4x32xf32>
    %454 = arith.mulf %449, %453 : vector<4x32xf32>
    %455 = vector.extract_strided_slice %256 {offsets = [28, 0], sizes = [4, 128], strides = [1, 1]} : vector<32x128xf32> to vector<4x128xf32>
    %cst_79 = arith.constant dense<0.000000e+00> : vector<4x128xf32>
    %456 = tpu.matmul %454, %252, %cst_79 {dimension_numbers = #tpu.dot_dimension_numbers<[1], [0], [0], [1], [0, 0, 1, 1], [], []>} : vector<4x32xf32>, vector<32x128xf32>, vector<4x128xf32> -> vector<4x128xf32>
    %457 = arith.addf %455, %456 : vector<4x128xf32>
    %458 = vector.extract_strided_slice %457 {offsets = [0, 0], sizes = [4, 32], strides = [1, 1]} : vector<4x128xf32> to vector<4x32xf32>
    %459 = arith.negf %458 : vector<4x32xf32>
    %460 = math.exp %459 : vector<4x32xf32>
    %cst_80 = arith.constant 1.000000e+00 : f32
    %461 = vector.broadcast %cst_80 : f32 to vector<4x32xf32>
    %462 = arith.addf %461, %460 : vector<4x32xf32>
    %463 = arith.divf %461, %462 : vector<4x32xf32>
    %464 = vector.extract_strided_slice %457 {offsets = [0, 32], sizes = [4, 32], strides = [1, 1]} : vector<4x128xf32> to vector<4x32xf32>
    %465 = arith.negf %464 : vector<4x32xf32>
    %466 = math.exp %465 : vector<4x32xf32>
    %cst_81 = arith.constant 1.000000e+00 : f32
    %467 = vector.broadcast %cst_81 : f32 to vector<4x32xf32>
    %468 = arith.addf %467, %466 : vector<4x32xf32>
    %469 = arith.divf %467, %468 : vector<4x32xf32>
    %470 = vector.extract_strided_slice %457 {offsets = [0, 64], sizes = [4, 32], strides = [1, 1]} : vector<4x128xf32> to vector<4x32xf32>
    %471 = math.tanh %470 : vector<4x32xf32>
    %472 = vector.extract_strided_slice %457 {offsets = [0, 96], sizes = [4, 32], strides = [1, 1]} : vector<4x128xf32> to vector<4x32xf32>
    %473 = arith.negf %472 : vector<4x32xf32>
    %474 = math.exp %473 : vector<4x32xf32>
    %cst_82 = arith.constant 1.000000e+00 : f32
    %475 = vector.broadcast %cst_82 : f32 to vector<4x32xf32>
    %476 = arith.addf %475, %474 : vector<4x32xf32>
    %477 = arith.divf %475, %476 : vector<4x32xf32>
    %478 = arith.mulf %469, %452 : vector<4x32xf32>
    %479 = arith.mulf %463, %471 : vector<4x32xf32>
    %480 = arith.addf %478, %479 : vector<4x32xf32>
    %481 = math.tanh %480 : vector<4x32xf32>
    %482 = arith.mulf %477, %481 : vector<4x32xf32>
    %483 = tpu.concatenate %286, %314, %342, %370, %398, %426, %454, %482 in 0 : vector<4x32xf32>, vector<4x32xf32>, vector<4x32xf32>, vector<4x32xf32>, vector<4x32xf32>, vector<4x32xf32>, vector<4x32xf32>, vector<4x32xf32> -> vector<32x32xf32>
    %c0_83 = arith.constant 0 : index
    %c0_84 = arith.constant 0 : index
    %484 = vector.load %arg7[%c0_83, %c0_84] : memref<32x32xf32, #tpu.memory_space<vmem>>, vector<32x32xf32>
    %cst_85 = arith.constant dense<0.000000e+00> : vector<32x32xf32>
    %485 = tpu.matmul %483, %484, %cst_85 {dimension_numbers = #tpu.dot_dimension_numbers<[1], [0], [0], [1], [0, 0, 1, 1], [], []>} : vector<32x32xf32>, vector<32x32xf32>, vector<32x32xf32> -> vector<32x32xf32>
    %c0_86 = arith.constant 0 : index
    %c0_87 = arith.constant 0 : index
    %486 = vector.load %arg8[%c0_86, %c0_87] : memref<1x32xf32, #tpu.memory_space<vmem>>, vector<1x32xf32>
    %487 = vector.broadcast %486 : vector<1x32xf32> to vector<32x32xf32>
    %488 = arith.addf %485, %487 : vector<32x32xf32>
    %489 = vector.extract_strided_slice %488 {offsets = [0, 0], sizes = [4, 32], strides = [1, 1]} : vector<32x32xf32> to vector<4x32xf32>
    %490 = vector.extract_strided_slice %488 {offsets = [4, 0], sizes = [4, 32], strides = [1, 1]} : vector<32x32xf32> to vector<4x32xf32>
    %491 = vector.extract_strided_slice %488 {offsets = [8, 0], sizes = [4, 32], strides = [1, 1]} : vector<32x32xf32> to vector<4x32xf32>
    %492 = vector.extract_strided_slice %488 {offsets = [12, 0], sizes = [4, 32], strides = [1, 1]} : vector<32x32xf32> to vector<4x32xf32>
    %493 = vector.extract_strided_slice %488 {offsets = [16, 0], sizes = [4, 32], strides = [1, 1]} : vector<32x32xf32> to vector<4x32xf32>
    %494 = vector.extract_strided_slice %488 {offsets = [20, 0], sizes = [4, 32], strides = [1, 1]} : vector<32x32xf32> to vector<4x32xf32>
    %495 = vector.extract_strided_slice %488 {offsets = [24, 0], sizes = [4, 32], strides = [1, 1]} : vector<32x32xf32> to vector<4x32xf32>
    %496 = vector.extract_strided_slice %488 {offsets = [28, 0], sizes = [4, 32], strides = [1, 1]} : vector<32x32xf32> to vector<4x32xf32>
    %497 = tpu.concatenate %489, %490, %491, %492, %493, %494, %495, %496 in 1 : vector<4x32xf32>, vector<4x32xf32>, vector<4x32xf32>, vector<4x32xf32>, vector<4x32xf32>, vector<4x32xf32>, vector<4x32xf32>, vector<4x32xf32> -> vector<4x256xf32>
    %c0_88 = arith.constant 0 : index
    %c0_89 = arith.constant 0 : index
    %498 = vector.load %arg9[%c0_88, %c0_89] : memref<4x256xf32, #tpu.memory_space<vmem>>, vector<4x256xf32>
    tpu.vector_store %arg9[%c0_88, %c0_89], %497 {strides = array<i32>} : memref<4x256xf32, #tpu.memory_space<vmem>>, vector<4x256xf32>,
    return
  }
}

</mosaic_0001>

<bundles_post_ra>
// kernel: my_model_forward.1
= control target key start
LH: loop header
LB: loop body
LE: loop exit
PB: predicated region body
PF: predicated region fallthrough
CT: control target
= control target key end

     0   :  { %14 = vsyncpa [#allocation3], 0  ;;  %s3506_s0 = inlined_call_operand.hbm [shape: f32[4,8,8], index: 0, kind: input, shape index: {}]   ;;  %s3507_s1 = inlined_call_operand.vmem [shape: f32[8,128], index: 1, kind: input, shape index: {}]   ;;  %s3508_s2 = inlined_call_operand.hbm [shape: f32[32,128], index: 2, kind: input, shape index: {}]   ;;  %s3509_s3 = inlined_call_operand.vmem [shape: f32[1,128], index: 3, kind: input, shape index: {}]   ;;  %s3510_s4 = inlined_call_operand.hbm [shape: f32[32,128], index: 4, kind: input, shape index: {}]   ;;  %s3511_s5 = inlined_call_operand.hbm [shape: f32[32,128], index: 5, kind: input, shape index: {}]   ;;  %s3512_s6 = inlined_call_operand.vmem [shape: f32[1,128], index: 6, kind: input, shape index: {}]   ;;  %s3513_s7 = inlined_call_operand.hbm [shape: f32[32,32], index: 7, kind: input, shape index: {}]   ;;  %s3514_s8 = inlined_call_operand.vmem [shape: f32[1,32], index: 8, kind: input, shape index: {}]   ;;  %s3515_s9 = inlined_call_operand.vmem [shape: f32[4,256], index: 9, kind: output, shape index: {}]  }
   0x1   :  { %15 = vsyncpa [#allocation5], 0 }
   0x2   :  { %16 = vsyncpa [#allocation8], 0  ;;  %s2972_s30 = smov [#allocation4]   ;;  %s2973_s11 = smov [#allocation7]  }
   0x3   :  { %s36_s10 = sshll.u32 %s2972_s30, 4  ;;  %s62_s12 = sshll.u32 %s2973_s11, 4  ;;  %s37_s10 = int_to_ptr.vmem [resolvable:$true] %s36_s10  ;;  %s3035_s12 = int_to_ptr.vmem [resolvable:$true] %s62_s12 }
   0x4   :  { %s2856_s15 = scalar_lea.hbm %s3508_s2, 512 }
   0x5   :  { %p2857_p0 = scmp.ne.s32.totalorder %s3508_s2, %s2856_s15  ;;  %p2860_p1 = scmp.lt.u32.totalorder %s2856_s15, %s3508_s2 }
   0x7   :  { %p2862_p2 = pnand %p2860_p1, %p2857_p0 }
   0x9   :  { %2865 = shalt.err (!%p2862_p2)
}
   0xa   :  { %s2866_s20 = scalar_lea.vmem %s37_s10, 512  ;;  %p2871_p4 = scmp.lt.s32.totalorder %s37_s10, %s37_s10 }
   0xb   :  { %p2867_p3 = scmp.ne.s32.totalorder %s37_s10, %s2866_s20  ;;  %p2872_p5 = scmp.lt.s32.totalorder %s2866_s20, %s2866_s20 }
   0xd   :  { %p2873_p6 = por %p2872_p5, %p2871_p4 }
   0xf   :  { %p2874_p7 = pnand %p2873_p6, %p2867_p3 }
  0x11   :  { %2877 = shalt.err (!%p2874_p7)
}
  0x12   :  { %s2974_s21 = smov 128   ;;  %s2975_s22 = smov 8  }
  0x13   :  { %42 = dma.hbm_to_vmem [thread:$0]  %s3508_s2, 512, %s37_s10, [#allocation5], %s2974_s21, %s2974_s21, %s2975_s22  }
  0x14   :  { %s2878_s27 = scalar_lea.hbm %s3511_s5, 512 }
  0x15   :  { %p2879_p8 = scmp.ne.s32.totalorder %s3511_s5, %s2878_s27  ;;  %p2882_p9 = scmp.lt.u32.totalorder %s2878_s27, %s3511_s5 }
  0x17   :  { %p2884_p10 = pnand %p2882_p9, %p2879_p8 }
  0x19   :  { %2887 = shalt.err (!%p2884_p10)
}
  0x1a   :  { %s2888_s13 = scalar_lea.vmem %s3035_s12, 512  ;;  %p2893_p12 = scmp.lt.s32.totalorder %s3035_s12, %s3035_s12 }
  0x1b   :  { %p2889_p11 = scmp.ne.s32.totalorder %s3035_s12, %s2888_s13  ;;  %p2894_p13 = scmp.lt.s32.totalorder %s2888_s13, %s2888_s13 }
  0x1d   :  { %p2895_p0 = por %p2894_p13, %p2893_p12 }
  0x1f   :  { %p2896_p1 = pnand %p2895_p0, %p2889_p11 }
  0x21   :  { %2899 = shalt.err (!%p2896_p1)
}
  0x22   :  { %68 = dma.hbm_to_vmem [thread:$0]  %s3511_s5, 512, %s3035_s12, [#allocation8], %s2974_s21, %s2974_s21, %s2975_s22  }
  0x23   :  { %s2976_s14 = smov [#allocation2]   ;;  %s2977_s16 = smov [#allocation6]  }
  0x24   :  { %s22_s15 = sshll.u32 %s2976_s14, 4  ;;  %s50_s17 = sshll.u32 %s2977_s16, 4  ;;  %s23_s15 = int_to_ptr.vmem [resolvable:$true] %s22_s15  ;;  %s3072_s17 = int_to_ptr.vmem [resolvable:$true] %s50_s17 }
  0x25   :  { %s2900_s20 = scalar_lea.hbm %s3506_s0, 512 }
  0x26   :  { %p2901_p2 = scmp.ne.s32.totalorder %s3506_s0, %s2900_s20  ;;  %p2904_p3 = scmp.lt.u32.totalorder %s2900_s20, %s3506_s0 }
  0x28   :  { %p2906_p4 = pnand %p2904_p3, %p2901_p2 }
  0x2a   :  { %2909 = shalt.err (!%p2906_p4)
}
  0x2b   :  { %s2910_s5 = scalar_lea.vmem %s23_s15, 512  ;;  %p2915_p6 = scmp.lt.s32.totalorder %s23_s15, %s23_s15 }
  0x2c   :  { %p2911_p5 = scmp.ne.s32.totalorder %s23_s15, %s2910_s5  ;;  %p2916_p7 = scmp.lt.s32.totalorder %s2910_s5, %s2910_s5 }
  0x2e   :  { %p2917_p8 = por %p2916_p7, %p2915_p6 }
  0x30   :  { %p2918_p9 = pnand %p2917_p8, %p2911_p5 }
  0x32   :  { %2921 = shalt.err (!%p2918_p9)
}
  0x33   :  { %28 = dma.hbm_to_vmem [thread:$0]  %s3506_s0, 512, %s23_s15, [#allocation3], %s2974_s21, %s2974_s21, %s2975_s22  }
  0x34   :  { %s2922_s30 = scalar_lea.hbm %s3510_s4, 512 }
  0x35   :  { %p2923_p10 = scmp.ne.s32.totalorder %s3510_s4, %s2922_s30  ;;  %p2926_p11 = scmp.lt.u32.totalorder %s2922_s30, %s3510_s4 }
  0x37   :  { %p2928_p12 = pnand %p2926_p11, %p2923_p10 }
  0x39   :  { %2931 = shalt.err (!%p2928_p12)
}
  0x3a   :  { %s2932_s14 = scalar_lea.vmem %s3072_s17, 512  ;;  %p2937_p0 = scmp.lt.s32.totalorder %s3072_s17, %s3072_s17 }
  0x3b   :  { %p2933_p13 = scmp.ne.s32.totalorder %s3072_s17, %s2932_s14  ;;  %p2938_p1 = scmp.lt.s32.totalorder %s2932_s14, %s2932_s14 }
  0x3d   :  { %p2939_p2 = por %p2938_p1, %p2937_p0 }
  0x3f   :  { %p2940_p3 = pnand %p2939_p2, %p2933_p13 }
  0x41   :  { %2943 = shalt.err (!%p2940_p3)
}
  0x42   :  { %56 = dma.hbm_to_vmem [thread:$0]  %s3510_s4, 512, %s3072_s17, [#allocation5], %s2974_s21, %s2974_s21, %s2975_s22  }
  0x43   :  { %s2978_s16 = smov [#allocation9]   ;;  %s2944_s23 = scalar_lea.hbm %s3513_s7, 512 }
  0x44   :  { %s76_s18 = sshll.u32 %s2978_s16, 4  ;;  %p2945_p4 = scmp.ne.s32.totalorder %s3513_s7, %s2944_s23  ;;  %s77_s18 = int_to_ptr.vmem [resolvable:$true] %s76_s18 }
  0x45   :  { %p2948_p5 = scmp.lt.u32.totalorder %s2944_s23, %s3513_s7 }
  0x47   :  { %p2950_p6 = pnand %p2948_p5, %p2945_p4 }
  0x49   :  { %2953 = shalt.err (!%p2950_p6)
}
  0x4a   :  { %s2954_s12 = scalar_lea.vmem %s77_s18, 512  ;;  %p2959_p8 = scmp.lt.s32.totalorder %s77_s18, %s77_s18 }
  0x4b   :  { %p2955_p7 = scmp.ne.s32.totalorder %s77_s18, %s2954_s12  ;;  %p2960_p9 = scmp.lt.s32.totalorder %s2954_s12, %s2954_s12 }
  0x4d   :  { %p2961_p10 = por %p2960_p9, %p2959_p8 }
  0x4f   :  { %p2962_p11 = pnand %p2961_p10, %p2955_p7 }
  0x51   :  { %2965 = shalt.err (!%p2962_p11)
}
  0x52   :  { %82 = dma.hbm_to_vmem [thread:$0]  %s3513_s7, 512, %s77_s18, [#allocation8], %s2974_s21, %s2974_s21, %s2975_s22  }
  0x53   :  { %2966 = dma.done.wait [#allocation3], 512  }
  0x54   :  { %2967 = vsyncadd [#allocation3], 4294966784 }
  0x55   :  { %2968 = dma.done.wait [#allocation5], 1024  }
  0x56   :  { %2969 = vsyncadd [#allocation5], 4294966272 }
  0x57   :  { %2970 = dma.done.wait [#allocation8], 1024  }
  0x58   :  { %2971 = vsyncadd [#allocation8], 4294966272  ;;  %v2979_v0 = vmov 0.0|0.0   ;;  %vm2980_vm0 = vmmov 0   ;;  %v2981_v1 = vmov 0.0   ;;  %vm109_vm1 = vcmask 1041409  }
  0x59   :  { %2609 = vmatprep.subr.bf16.mxu0 %v2979_v0  ;;  %2418 = vmatprep.mubr.msk.f32.mxu0 %vm2980_vm0, %v2981_v1  ;;  %vm112_vm2 = vcmask 1042434   ;;  %vm115_vm3 = vcmask 1043459   ;;  %vm120_vm4 = vcmask 1045509   ;;  %vm123_vm5 = vcmask 1046534   ;;  %v179_v2 = vld [vmem:[%s3507_s1] sm:$0xff]  ;;  %v3130_v3 = vld [vmem:[#allocation2] sm:$0xff] }
  0x5a   :  { %v3132_v4 = vld [vmem:[#allocation2 + $0x8] sm:$0xff]  ;;  %vm126_vm6 = vcmask 1047559   ;;  %vm174_vm7 = vcmask 1043456   ;;  %vm191_vm8 = vcmask 64512   ;;  %2391 = vmatprep.subr.mxu1 %v179_v2  ;;  %v3134_v5 = vld [vmem:[#allocation2 + $0x10] sm:$0xff]  ;;  %v3136_v6 = vld [vmem:[#allocation2 + $0x18] sm:$0xff] }
  0x5b   :  { %v108_v7 = vrot.slane %v3132_v4, 7  ;;  %v118_v8 = vrot.slane %v3130_v3, 5  ;;  %v119_v9 = vrot.slane %v3132_v4, 4  ;;  %v129_v10 = vrot.slane %v3130_v3, 2  ;;  %2392 = vmatpush3.msra.mxu1 %v179_v2  ;;  %v180_v23 = vld [vmem:[#allocation4] sm:$0xff]  ;;  %v181_v24 = vld [vmem:[#allocation4 + $0x8] sm:$0xff] }
  0x5c   :  { %v111_v11 = vrot.slane %v3134_v5, 6  ;;  %v114_v12 = vrot.slane %v3136_v6, 5  ;;  %v122_v13 = vrot.slane %v3134_v5, 3  ;;  %v125_v14 = vrot.slane %v3136_v6, 2  ;;  %2603 = vmatprep.subr.bf16.mxu1 %v2979_v0  ;;  %v182_v49 = vld [vmem:[#allocation4 + $0x10] sm:$0xff]  ;;  %v183_v50 = vld [vmem:[#allocation4 + $0x18] sm:$0xff] }
  0x5d   :  { %v110_v15 = vsel %vm109_vm1, %v108_v7, %v3130_v3  ;;  %v121_v16 = vsel %vm120_vm4, %v119_v9, %v118_v8  ;;  %v130_v17 = vrot.slane %v3132_v4, 1  ;;  %v133_v18 = vrot.slane %v3136_v6, 7  ;;  %s2982_s27 = smov 64   ;;  %s2984_s11 = smov 96  }
  0x5e   :  { %v113_v19 = vsel %vm112_vm2, %v111_v11, %v110_v15  ;;  %v124_v20 = vsel %vm123_vm5, %v122_v13, %v121_v16  ;;  %v136_v21 = vrot.slane %v3130_v3, 7  ;;  %v137_v22 = vrot.slane %v3132_v4, 6 }
  0x5f   :  { %v116_v25 = vsel %vm115_vm3, %v114_v12, %v113_v19  ;;  %v127_v26 = vsel %vm126_vm6, %v125_v14, %v124_v20  ;;  %v131_v27 = vsel %vm109_vm1, %v130_v17, %v129_v10  ;;  %v139_v28 = vrot.slane %v3134_v5, 5 }
  0x60   :  { %v175_v29 = vsel %vm174_vm7, %v116_v25, %v127_v26  ;;  %v132_v30 = vsel %vm112_vm2, %v3134_v5, %v131_v27  ;;  %v138_v31 = vsel %vm120_vm4, %v137_v22, %v136_v21  ;;  %v141_v32 = vrot.slane %v3136_v6, 4 }
  0x61   :  { %2393 = vmatprep.mubr.msk.f32.mxu1 %vm191_vm8, %v175_v29  ;;  %v134_v33 = vsel %vm115_vm3, %v133_v18, %v132_v30  ;;  %v140_v34 = vsel %vm123_vm5, %v139_v28, %v138_v31  ;;  %v3168_v35 = vpack.c.bf16 %v181_v24, %v180_v23  ;;  %v144_v36 = vrot.slane %v3130_v3, 4 }
  0x62   :  { %v142_v37 = vsel %vm126_vm6, %v141_v32, %v140_v34  ;;  %v145_v38 = vrot.slane %v3132_v4, 3  ;;  %v147_v39 = vrot.slane %v3134_v5, 2  ;;  %v149_v40 = vrot.slane %v3136_v6, 1 }
  0x63   :  { %v176_v41 = vsel %vm174_vm7, %v134_v33, %v142_v37  ;;  %v152_v42 = vrot.slane %v3130_v3, 1  ;;  %v154_v43 = vrot.slane %v3134_v5, 7  ;;  %v156_v44 = vrot.slane %v3136_v6, 6  ;;  %2611 = vmatpush3.bf16.msra.mxu0 %v3168_v35 }
  0x64   :  { %2394 = vmatmul.mubr.msk.f32.vlgmr.msra.gmra.mrb[0].mxu1 %vm191_vm8, %v176_v41  ;;  %v146_v45 = vsel %vm109_vm1, %v145_v38, %v144_v36  ;;  %v159_v46 = vrot.slane %v3130_v3, 6  ;;  %v160_v47 = vrot.slane %v3132_v4, 5  ;;  %v162_v48 = vrot.slane %v3134_v5, 4  ;;  %2612 = vmatprep.subr.bf16.mxu0 %v2979_v0 }
  0x65   :  { %2605 = vmatpush3.bf16.msra.mxu1 %v3168_v35  ;;  %v148_v51 = vsel %vm112_vm2, %v147_v39, %v146_v45  ;;  %v153_v52 = vsel %vm120_vm4, %v3132_v4, %v152_v42  ;;  %v164_v53 = vrot.slane %v3136_v6, 3  ;;  %v167_v54 = vrot.slane %v3130_v3, 3 }
  0x66   :  { %v150_v55 = vsel %vm115_vm3, %v149_v40, %v148_v51  ;;  %v155_v56 = vsel %vm123_vm5, %v154_v43, %v153_v52  ;;  %2606 = vmatprep.subr.bf16.mxu1 %v2979_v0  ;;  %v161_v57 = vsel %vm109_vm1, %v160_v47, %v159_v46  ;;  %v168_v58 = vrot.slane %v3132_v4, 2 }
  0x67   :  { %v157_v59 = vsel %vm126_vm6, %v156_v44, %v155_v56  ;;  %v163_v60 = vsel %vm112_vm2, %v162_v48, %v161_v57  ;;  %v170_v61 = vrot.slane %v3134_v5, 1  ;;  %v3200_v62 = vpack.c.bf16 %v183_v50, %v182_v49 }
  0x68   :  { %v177_v63 = vsel %vm174_vm7, %v150_v55, %v157_v59  ;;  %v165_v2 = vsel %vm115_vm3, %v164_v53, %v163_v60  ;;  %v169_v3 = vsel %vm120_vm4, %v168_v58, %v167_v54  ;;  %vm289_vm9 = vcmask 261120  }
  0x69   :  { %2396 = vmatprep.mubr.msk.f32.mxu1 %vm191_vm8, %v177_v63  ;;  %v171_v7 = vsel %vm123_vm5, %v170_v61, %v169_v3  ;;  %2608 = vmatpush3.bf16.msra.mxu1 %v3200_v62  ;;  %vm2226_vm10 = vcmask 523264   ;;  %vm2228_vm11 = vcmask 785408  }
  0x6a   :  { %v172_v4 = vsel %vm126_vm6, %v3136_v6, %v171_v7  ;;  %2614 = vmatpush3.bf16.msra.mxu0 %v3200_v62  ;;  %2615 = vmatprep.subr.bf16.mxu1 %v2979_v0  ;;  %v2245_v6 = vld [vmem:[%s3509_s3] ss:$0 sm:$0xff]  ;;  %s2983_s3 = smov 32  }
  0x6b   :  { %v178_v5 = vsel %vm174_vm7, %v165_v2, %v172_v4  ;;  %2621 = vmatprep.subr.bf16.mxu0 %v2979_v0 }
  0x6c   :  { %2397 = vmatmul.mubr.msk.f32.gmra.mrb[2].mxu1 %vm191_vm8, %v178_v5 }
  0x6d   :  { %2407 = vmatprep.mubr.msk.f32.mxu1 %vm2980_vm0, %v2981_v1 }
  0x70   :  { %2408 = vmatmul.mubr.f32.vlgmr.msra.gmra.mrb[4].mxu1 %v2981_v1 }
  0x71   :  { %2617 = vmatpush3.bf16.msra.mxu1 %v3168_v35  ;;  %2429 = vmatprep.mubr.msk.f32.mxu1 %vm2980_vm0, %v2981_v1 }
  0x72   :  { %2618 = vmatprep.subr.bf16.mxu1 %v2979_v0 }
  0x75   :  { %2620 = vmatpush3.bf16.msra.mxu1 %v3200_v62 }
  0x76   :  { %2627 = vmatprep.subr.bf16.mxu1 %v2979_v0 }
 0x137   :  { %v2395_v8 = vpop.f32.mrb[0].mxu1 }
 0x138   :  { %v3227_v9 = vadd.f32 %v2395_v8, %v2245_v6  ;;  %v270_v10 = vpop.f32.mrb[1].mxu1 }
 0x139   :  { %v271_v15 = vadd.f32 %v2245_v6, %v270_v10 }
 0x13f   :  { %v2398_v11 = vpop.f32.mrb[2].mxu1 }
 0x140   :  { %v3229_v12 = vadd.f32 %v2398_v11, %v2245_v6  ;;  %v280_v13 = vpop.f32.mrb[3].mxu1 }
 0x141   :  { %v3231_v14 = vadd.f32 %v2245_v6, %v280_v13 }
 0x143   :  { %v359_v16 = vpop.f32.mrb[4].mxu1 }
 0x144   :  { %v363_v17 = vadd.f32 %v359_v16, %v271_v15  ;;  %v2409_v18 = vpop.f32.mrb[5].mxu1 }
 0x146   :  { %2728 = vtanh.f32 %v363_v17  ;;  %v2250_v20 = vmul.f32 -1.442695, %v363_v17 }
 0x148   :  { %2730 = vpow2.f32 %v2250_v20 }
 0x150   :  { %v2729_v19 = vpop.eup %2728 }
 0x151   :  { %373 = vrot.lane.b32.xlu0 %v2729_v19, %s2982_s27 }
 0x152   :  { %v2731_v21 = vpop.eup %2730 }
 0x153   :  { %v367_v22 = vadd.f32 1.0, %v2731_v21 }
 0x155   :  { %2732 = vrcp.f32 %v367_v22 }
 0x15f   :  { %v2733_v23 = vpop.eup %2732 }
 0x160   :  { %v371_v26 = vmul.f32 0.0, %v2733_v23 }
 0x1c3   :  { %v374_v24 = vpop.permute.xlu0 %373 }
 0x1c4   :  { %v376_v25 = vmul.f32 %v2733_v23, %v374_v24 }
 0x1c6   :  { %378 = vrot.lane.b32.xlu0 %v376_v25, %s2983_s3 }
 0x238   :  { %v379_v27 = vpop.permute.xlu0 %378 }
 0x239   :  { %v381_v28 = vadd.f32 %v379_v27, %v371_v26 }
 0x23b   :  { %2734 = vtanh.f32 %v381_v28  ;;  %v475_v45 = vrot.slane %v381_v28, 4 }
 0x245   :  { %v2735_v29 = vpop.eup %2734 }
 0x246   :  { %384 = vrot.lane.b32.xlu1 %v2735_v29, %s2982_s27 }
 0x2b8   :  { %v385_v30 = vpop.permute.xlu1 %384 }
 0x2b9   :  { %v3236_v31 = vmul.f32 %v2733_v23, %v385_v30 }
 0x2bb   :  { %389 = vrot.lane.b32.xlu1 %v3236_v31, %s2983_s3 }
 0x32d   :  { %v390_v32 = vpop.permute.xlu1 %389 }
 0x32e   :  { %2419 = vmatmul.mubr.msk.f32.vlgmr.msra.gmra.mrb[0].mxu0 %vm289_vm9, %v390_v32 }
 0x32f   :  { %2623 = vmatpush3.bf16.msra.mxu0 %v3168_v35  ;;  %2440 = vmatprep.mubr.msk.f32.mxu0 %vm2980_vm0, %v2981_v1 }
 0x330   :  { %2624 = vmatprep.subr.bf16.mxu0 %v2979_v0 }
 0x333   :  { %2626 = vmatpush3.bf16.msra.mxu0 %v3200_v62 }
 0x334   :  { %2633 = vmatprep.subr.bf16.mxu0 %v2979_v0 }
 0x401   :  { %v459_v33 = vpop.f32.mrb[0].mxu0 }
 0x402   :  { %v464_v34 = vrot.slane %v459_v33, 4  ;;  %v2420_v36 = vpop.f32.mrb[1].mxu0 }
 0x404   :  { %v466_v37 = vadd.f32 %v464_v34, %v271_v15 }
 0x406   :  { %2736 = vtanh.f32 %v466_v37  ;;  %v2252_v39 = vmul.f32 -1.442695, %v466_v37 }
 0x408   :  { %2738 = vpow2.f32 %v2252_v39 }
 0x410   :  { %v2737_v38 = vpop.eup %2736 }
 0x411   :  { %479 = vrot.lane.b32.xlu0 %v2737_v38, %s2982_s27 }
 0x412   :  { %v2739_v40 = vpop.eup %2738 }
 0x413   :  { %v470_v41 = vadd.f32 1.0, %v2739_v40 }
 0x415   :  { %2740 = vrcp.f32 %v470_v41 }
 0x41f   :  { %v2741_v42 = vpop.eup %2740 }
 0x420   :  { %v477_v46 = vmul.f32 %v2741_v42, %v475_v45 }
 0x483   :  { %v480_v43 = vpop.permute.xlu0 %479 }
 0x484   :  { %v482_v44 = vmul.f32 %v2741_v42, %v480_v43 }
 0x486   :  { %484 = vrot.lane.b32.xlu1 %v482_v44, %s2983_s3 }
 0x4f8   :  { %v485_v47 = vpop.permute.xlu1 %484 }
 0x4f9   :  { %v487_v48 = vadd.f32 %v485_v47, %v477_v46 }
 0x4fb   :  { %2742 = vtanh.f32 %v487_v48  ;;  %v579_v3 = vrot.slane %v487_v48, 4 }
 0x505   :  { %v2743_v49 = vpop.eup %2742 }
 0x506   :  { %490 = vrot.lane.b32.xlu0 %v2743_v49, %s2982_s27 }
 0x578   :  { %v491_v50 = vpop.permute.xlu0 %490 }
 0x579   :  { %v3250_v51 = vmul.f32 %v2741_v42, %v491_v50 }
 0x57b   :  { %v495_v52 = vrot.slane %v3250_v51, 4 }
 0x57d   :  { %496 = vrot.lane.b32.xlu1 %v495_v52, %s2983_s3 }
 0x5ef   :  { %v497_v53 = vpop.permute.xlu1 %496 }
 0x5f0   :  { %2430 = vmatmul.mubr.msk.f32.vlgmr.msra.gmra.mrb[6].mxu1 %vm289_vm9, %v497_v53 }
 0x5f1   :  { %2629 = vmatpush3.bf16.msra.mxu1 %v3168_v35  ;;  %2451 = vmatprep.mubr.msk.f32.mxu1 %vm2980_vm0, %v2981_v1 }
 0x5f2   :  { %2630 = vmatprep.subr.bf16.mxu1 %v2979_v0 }
 0x5f5   :  { %2632 = vmatpush3.bf16.msra.mxu1 %v3200_v62 }
 0x5f6   :  { %2639 = vmatprep.subr.bf16.mxu1 %v2979_v0 }
 0x6c3   :  { %v566_v54 = vpop.f32.mrb[6].mxu1 }
 0x6c4   :  { %v570_v55 = vadd.f32 %v566_v54, %v3227_v9  ;;  %v2431_v56 = vpop.f32.mrb[7].mxu1 }
 0x6c6   :  { %2744 = vtanh.f32 %v570_v55  ;;  %v2254_v58 = vmul.f32 -1.442695, %v570_v55 }
 0x6c8   :  { %2746 = vpow2.f32 %v2254_v58 }
 0x6d0   :  { %v2745_v57 = vpop.eup %2744 }
 0x6d1   :  { %583 = vrot.lane.b32.xlu0 %v2745_v57, %s2982_s27 }
 0x6d2   :  { %v2747_v59 = vpop.eup %2746 }
 0x6d3   :  { %v574_v60 = vadd.f32 1.0, %v2747_v59 }
 0x6d5   :  { %2748 = vrcp.f32 %v574_v60 }
 0x6df   :  { %v2749_v61 = vpop.eup %2748 }
 0x6e0   :  { %v581_v7 = vmul.f32 %v2749_v61, %v579_v3 }
 0x743   :  { %v584_v63 = vpop.permute.xlu0 %583 }
 0x744   :  { %v586_v2 = vmul.f32 %v2749_v61, %v584_v63 }
 0x746   :  { %588 = vrot.lane.b32.xlu1 %v586_v2, %s2983_s3 }
 0x7b8   :  { %v589_v4 = vpop.permute.xlu1 %588 }
 0x7b9   :  { %v591_v5 = vadd.f32 %v589_v4, %v581_v7 }
 0x7bb   :  { %2750 = vtanh.f32 %v591_v5  ;;  %v685_v25 = vrot.slane %v591_v5, 4 }
 0x7c5   :  { %v2751_v6 = vpop.eup %2750 }
 0x7c6   :  { %594 = vrot.lane.b32.xlu0 %v2751_v6, %s2982_s27 }
 0x838   :  { %v595_v8 = vpop.permute.xlu0 %594 }
 0x839   :  { %v3265_v10 = vmul.f32 %v2749_v61, %v595_v8 }
 0x83b   :  { %599 = vrot.lane.b32.xlu1 %v3265_v10, %s2983_s3 }
 0x8ad   :  { %v600_v11 = vpop.permute.xlu1 %599 }
 0x8ae   :  { %2441 = vmatmul.mubr.msk.f32.vlgmr.msra.gmra.mrb[2].mxu0 %vm289_vm9, %v600_v11 }
 0x8af   :  { %2635 = vmatpush3.bf16.msra.mxu0 %v3168_v35  ;;  %2462 = vmatprep.mubr.msk.f32.mxu0 %vm2980_vm0, %v2981_v1 }
 0x8b0   :  { %2636 = vmatprep.subr.bf16.mxu0 %v2979_v0 }
 0x8b3   :  { %2638 = vmatpush3.bf16.msra.mxu0 %v3200_v62 }
 0x8b4   :  { %2645 = vmatprep.subr.bf16.mxu0 %v2979_v0 }
 0x981   :  { %v669_v13 = vpop.f32.mrb[2].mxu0 }
 0x982   :  { %v674_v15 = vrot.slane %v669_v13, 4  ;;  %v2442_v16 = vpop.f32.mrb[3].mxu0 }
 0x984   :  { %v676_v17 = vadd.f32 %v674_v15, %v3227_v9 }
 0x986   :  { %2752 = vtanh.f32 %v676_v17  ;;  %v2256_v19 = vmul.f32 -1.442695, %v676_v17 }
 0x988   :  { %2754 = vpow2.f32 %v2256_v19 }
 0x990   :  { %v2753_v18 = vpop.eup %2752 }
 0x991   :  { %689 = vrot.lane.b32.xlu0 %v2753_v18, %s2982_s27 }
 0x992   :  { %v2755_v20 = vpop.eup %2754 }
 0x993   :  { %v680_v21 = vadd.f32 1.0, %v2755_v20 }
 0x995   :  { %2756 = vrcp.f32 %v680_v21 }
 0x99f   :  { %v2757_v22 = vpop.eup %2756 }
 0x9a0   :  { %v687_v26 = vmul.f32 %v2757_v22, %v685_v25 }
 0xa03   :  { %v690_v23 = vpop.permute.xlu0 %689 }
 0xa04   :  { %v692_v24 = vmul.f32 %v2757_v22, %v690_v23 }
 0xa06   :  { %694 = vrot.lane.b32.xlu1 %v692_v24, %s2983_s3 }
 0xa78   :  { %v695_v27 = vpop.permute.xlu1 %694 }
 0xa79   :  { %v697_v28 = vadd.f32 %v695_v27, %v687_v26 }
 0xa7b   :  { %2758 = vtanh.f32 %v697_v28  ;;  %v789_v45 = vrot.slane %v697_v28, 4  ;;  %v1128_v28 = vld [vmem:[#allocation6] sm:$0xff] }
 0xa85   :  { %v2759_v9 = vpop.eup %2758 }
 0xa86   :  { %700 = vrot.lane.b32.xlu0 %v2759_v9, %s2982_s27  ;;  %v1129_v9 = vld [vmem:[#allocation6 + $0x8] sm:$0xff] }
 0xaf8   :  { %v701_v29 = vpop.permute.xlu0 %700 }
 0xaf9   :  { %v3280_v30 = vmul.f32 %v2757_v22, %v701_v29  ;;  %v2651_v29 = vpack.c.bf16 %v1129_v9, %v1128_v28 }
 0xafb   :  { %v705_v32 = vrot.slane %v3280_v30, 4 }
 0xafd   :  { %706 = vrot.lane.b32.xlu1 %v705_v32, %s2983_s3 }
 0xb6f   :  { %v707_v33 = vpop.permute.xlu1 %706 }
 0xb70   :  { %2452 = vmatmul.mubr.msk.f32.vlgmr.msra.gmra.mrb[8].mxu1 %vm289_vm9, %v707_v33  ;;  %v1124_v33 = vsel %vm174_vm7, %v3236_v31, %v3250_v51  ;;  %v1125_v31 = vsel %vm174_vm7, %v3265_v10, %v3280_v30  ;;  %v1132_v51 = vld [vmem:[#allocation7] sm:$0xff] }
 0xb71   :  { %2641 = vmatpush3.bf16.msra.mxu1 %v3168_v35  ;;  %2473 = vmatprep.mubr.msk.f32.mxu1 %vm2980_vm0, %v2981_v1 }
 0xb72   :  { %2642 = vmatprep.subr.bf16.mxu1 %v2979_v0 }
 0xb75   :  { %2644 = vmatpush3.bf16.msra.mxu1 %v3200_v62 }
 0xb76   :  { %2652 = vmatprep.subr.bf16.mxu1 %v2651_v29 }
 0xc43   :  { %v776_v34 = vpop.f32.mrb[8].mxu1 }
 0xc44   :  { %v780_v36 = vadd.f32 %v776_v34, %v3231_v14  ;;  %v2453_v37 = vpop.f32.mrb[9].mxu1  ;;  %v1130_v34 = vld [vmem:[#allocation6 + $0x10] sm:$0xff] }
 0xc46   :  { %2760 = vtanh.f32 %v780_v36  ;;  %v2258_v39 = vmul.f32 -1.442695, %v780_v36  ;;  %v1131_v36 = vld [vmem:[#allocation6 + $0x18] sm:$0xff] }
 0xc47   :  { %v2655_v37 = vpack.c.bf16 %v1131_v36, %v1130_v34 }
 0xc48   :  { %2762 = vpow2.f32 %v2258_v39 }
 0xc50   :  { %v2761_v38 = vpop.eup %2760 }
 0xc51   :  { %793 = vrot.lane.b32.xlu0 %v2761_v38, %s2982_s27 }
 0xc52   :  { %v2763_v40 = vpop.eup %2762 }
 0xc53   :  { %v784_v41 = vadd.f32 1.0, %v2763_v40 }
 0xc55   :  { %2764 = vrcp.f32 %v784_v41  ;;  %v1133_v41 = vld [vmem:[#allocation7 + $0x8] sm:$0xff] }
 0xc5f   :  { %v2765_v42 = vpop.eup %2764 }
 0xc60   :  { %v791_v46 = vmul.f32 %v2765_v42, %v789_v45 }
 0xcc3   :  { %v794_v43 = vpop.permute.xlu0 %793 }
 0xcc4   :  { %v796_v44 = vmul.f32 %v2765_v42, %v794_v43  ;;  %v1134_v43 = vld [vmem:[#allocation7 + $0x10] sm:$0xff] }
 0xcc6   :  { %798 = vrot.lane.b32.xlu1 %v796_v44, %s2983_s3  ;;  %v1135_v44 = vld [vmem:[#allocation7 + $0x18] sm:$0xff] }
 0xd38   :  { %v799_v47 = vpop.permute.xlu1 %798 }
 0xd39   :  { %v801_v48 = vadd.f32 %v799_v47, %v791_v46  ;;  %v3339_v46 = vpack.c.bf16 %v1135_v44, %v1134_v43 }
 0xd3b   :  { %2766 = vtanh.f32 %v801_v48 }
 0xd45   :  { %v2767_v49 = vpop.eup %2766 }
 0xd46   :  { %804 = vrot.lane.b32.xlu0 %v2767_v49, %s2982_s27 }
 0xdb8   :  { %v805_v50 = vpop.permute.xlu0 %804 }
 0xdb9   :  { %v3294_v52 = vmul.f32 %v2765_v42, %v805_v50  ;;  %v3335_v42 = vpack.c.bf16 %v1133_v41, %v1132_v51  ;;  %v3362_v50 = vld [vmem:[%s3512_s6] ss:$0 sm:$0xff] }
 0xdbb   :  { %809 = vrot.lane.b32.xlu1 %v3294_v52, %s2983_s3 }
 0xe2d   :  { %v810_v53 = vpop.permute.xlu1 %809 }
 0xe2e   :  { %2463 = vmatmul.mubr.msk.f32.vlgmr.msra.gmra.mrb[4].mxu0 %vm289_vm9, %v810_v53 }
 0xe2f   :  { %2647 = vmatpush3.bf16.msra.mxu0 %v3168_v35  ;;  %2484 = vmatprep.mubr.msk.f32.mxu0 %vm2980_vm0, %v2981_v1 }
 0xe30   :  { %2648 = vmatprep.subr.bf16.mxu0 %v2979_v0 }
 0xe33   :  { %2650 = vmatpush3.bf16.msra.mxu0 %v3200_v62  ;;  %v895_v62 = vrot.slane %v801_v48, 4 }
 0xe34   :  { %2659 = vmatprep.subr.bf16.mxu0 %v2979_v0 }
 0xf01   :  { %v879_v54 = vpop.f32.mrb[4].mxu0 }
 0xf02   :  { %v884_v55 = vrot.slane %v879_v54, 4  ;;  %v2464_v56 = vpop.f32.mrb[5].mxu0 }
 0xf04   :  { %v886_v57 = vadd.f32 %v884_v55, %v3231_v14 }
 0xf06   :  { %2768 = vtanh.f32 %v886_v57  ;;  %v2260_v59 = vmul.f32 -1.442695, %v886_v57 }
 0xf08   :  { %2770 = vpow2.f32 %v2260_v59 }
 0xf10   :  { %v2769_v58 = vpop.eup %2768 }
 0xf11   :  { %899 = vrot.lane.b32.xlu0 %v2769_v58, %s2982_s27 }
 0xf12   :  { %v2771_v35 = vpop.eup %2770 }
 0xf13   :  { %v890_v60 = vadd.f32 1.0, %v2771_v35 }
 0xf15   :  { %2772 = vrcp.f32 %v890_v60 }
 0xf1f   :  { %v2773_v61 = vpop.eup %2772 }
 0xf20   :  { %v897_v3 = vmul.f32 %v2773_v61, %v895_v62 }
 0xf83   :  { %v900_v63 = vpop.permute.xlu0 %899 }
 0xf84   :  { %v902_v2 = vmul.f32 %v2773_v61, %v900_v63 }
 0xf86   :  { %904 = vrot.lane.b32.xlu1 %v902_v2, %s2983_s3 }
 0xff8   :  { %v905_v7 = vpop.permute.xlu1 %904 }
 0xff9   :  { %v907_v4 = vadd.f32 %v905_v7, %v897_v3 }
 0xffb   :  { %2774 = vtanh.f32 %v907_v4  ;;  %v999_v24 = vrot.slane %v907_v4, 4 }
0x1005   :  { %v2775_v14 = vpop.eup %2774 }
0x1006   :  { %910 = vrot.lane.b32.xlu0 %v2775_v14, %s2982_s27 }
0x1078   :  { %v911_v5 = vpop.permute.xlu0 %910 }
0x1079   :  { %v3309_v6 = vmul.f32 %v2773_v61, %v911_v5 }
0x107b   :  { %v915_v8 = vrot.slane %v3309_v6, 4 }
0x107d   :  { %916 = vrot.lane.b32.xlu1 %v915_v8, %s2983_s3 }
0x10ef   :  { %v917_v11 = vpop.permute.xlu1 %916 }
0x10f0   :  { %2474 = vmatmul.mubr.msk.f32.vlgmr.msra.gmra.mrb[10].mxu1 %vm289_vm9, %v917_v11 }
0x10f1   :  { %2654 = vmatpush3.bf16.msra.mxu1 %v2651_v29 }
0x10f2   :  { %2656 = vmatprep.subr.bf16.mxu1 %v2655_v37 }
0x10f5   :  { %2658 = vmatpush3.bf16.msra.mxu1 %v2655_v37 }
0x10f6   :  { %2665 = vmatprep.subr.bf16.mxu1 %v2979_v0 }
0x11c3   :  { %v986_v13 = vpop.f32.mrb[10].mxu1 }
0x11c4   :  { %v990_v15 = vadd.f32 %v986_v13, %v3229_v12  ;;  %v2475_v16 = vpop.f32.mrb[11].mxu1 }
0x11c6   :  { %2776 = vtanh.f32 %v990_v15  ;;  %v2262_v18 = vmul.f32 -1.442695, %v990_v15 }
0x11c8   :  { %2778 = vpow2.f32 %v2262_v18 }
0x11d0   :  { %v2777_v17 = vpop.eup %2776 }
0x11d1   :  { %1003 = vrot.lane.b32.xlu0 %v2777_v17, %s2982_s27 }
0x11d2   :  { %v2779_v19 = vpop.eup %2778 }
0x11d3   :  { %v994_v20 = vadd.f32 1.0, %v2779_v19 }
0x11d5   :  { %2780 = vrcp.f32 %v994_v20 }
0x11df   :  { %v2781_v21 = vpop.eup %2780 }
0x11e0   :  { %v1001_v25 = vmul.f32 %v2781_v21, %v999_v24 }
0x1243   :  { %v1004_v22 = vpop.permute.xlu0 %1003 }
0x1244   :  { %v1006_v23 = vmul.f32 %v2781_v21, %v1004_v22 }
0x1246   :  { %1008 = vrot.lane.b32.xlu1 %v1006_v23, %s2983_s3 }
0x12b8   :  { %v1009_v26 = vpop.permute.xlu1 %1008 }
0x12b9   :  { %v3317_v27 = vadd.f32 %v1009_v26, %v1001_v25 }
0x12bb   :  { %2782 = vtanh.f32 %v3317_v27  ;;  %v1105_v11 = vrot.slane %v3317_v27, 4 }
0x12c5   :  { %v2783_v32 = vpop.eup %2782 }
0x12c6   :  { %1014 = vrot.lane.b32.xlu0 %v2783_v32, %s2982_s27 }
0x12ca   :  { %1147 = vrot.lane.b32.xlu0 %v1124_v33, %s2983_s3 }
0x1338   :  { %v1015_v38 = vpop.permute.xlu0 %1014 }
0x1339   :  { %v3326_v39 = vmul.f32 %v2781_v21, %v1015_v38  ;;  %v1126_v21 = vsel %vm174_vm7, %v3294_v52, %v3309_v6 }
0x133b   :  { %1019 = vrot.lane.b32.xlu1 %v3326_v39, %s2983_s3 }
0x133c   :  { %v1148_v40 = vpop.permute.xlu0 %1147 }
0x133d   :  { %2495 = vmatprep.mubr.msk.f32.mxu1 %vm289_vm9, %v1148_v40 }
0x133f   :  { %1149 = vrot.lane.b32.xlu1 %v1125_v31, %s2983_s3 }
0x13ad   :  { %v1020_v45 = vpop.permute.xlu1 %1019 }
0x13ae   :  { %2485 = vmatmul.mubr.msk.f32.vlgmr.msra.gmra.mrb[6].mxu0 %vm289_vm9, %v1020_v45 }
0x13af   :  { %2661 = vmatpush3.bf16.msra.mxu0 %v3335_v42  ;;  %2509 = vmatprep.mubr.msk.f32.mxu0 %vm2980_vm0, %v2981_v1 }
0x13b0   :  { %2662 = vmatprep.subr.bf16.mxu0 %v2979_v0 }
0x13b1   :  { %v1150_v10 = vpop.permute.xlu1 %1149 }
0x13b2   :  { %2496 = vmatmul.mubr.msk.f32.vlgmr.msra.gmra.mrb[12].mxu1 %vm289_vm9, %v1150_v10 }
0x13b3   :  { %2664 = vmatpush3.bf16.msra.mxu0 %v3339_v46  ;;  %2667 = vmatpush3.bf16.msra.mxu1 %v3335_v42 }
0x13b4   :  { %2668 = vmatprep.subr.bf16.mxu1 %v2979_v0  ;;  %2671 = vmatprep.subr.bf16.mxu0 %v2979_v0 }
0x13b6   :  { %2510 = vmatmul.mubr.f32.vlgmr.msra.gmra.mrb[8].mxu0 %v2981_v1 }
0x13b7   :  { %2670 = vmatpush3.bf16.msra.mxu1 %v3339_v46  ;;  %2673 = vmatpush3.bf16.msra.mxu0 %v3335_v42 }
0x13b8   :  { %2674 = vmatprep.subr.bf16.mxu0 %v2979_v0  ;;  %2531 = vmatprep.mubr.msk.f32.mxu0 %vm2980_vm0, %v2981_v1 }
0x13b9   :  { %2677 = vmatprep.subr.bf16.mxu1 %v2979_v0 }
0x13bb   :  { %2676 = vmatpush3.bf16.msra.mxu0 %v3339_v46 }
0x13bc   :  { %2683 = vmatprep.subr.bf16.mxu0 %v2979_v0 }
0x1481   :  { %v1089_v30 = vpop.f32.mrb[6].mxu0 }
0x1482   :  { %v1094_v47 = vrot.slane %v1089_v30, 4  ;;  %v2486_v48 = vpop.f32.mrb[7].mxu0 }
0x1484   :  { %v1096_v49 = vadd.f32 %v1094_v47, %v3229_v12 }
0x1485   :  { %v3364_v53 = vpop.f32.mrb[12].mxu1 }
0x1486   :  { %2784 = vtanh.f32 %v1096_v49  ;;  %v1229_v54 = vpop.f32.mrb[13].mxu1  ;;  %v2264_v35 = vmul.f32 -1.442695, %v1096_v49 }
0x1487   :  { %v3367_v55 = vadd.f32 %v3362_v50, %v1229_v54 }
0x1489   :  { %v1314_v56 = vpop.f32.mrb[8].mxu0 }
0x148a   :  { %v1318_v57 = vadd.f32 %v1314_v56, %v3367_v55  ;;  %v2511_v58 = vpop.f32.mrb[9].mxu0 }
0x148c   :  { %2786 = vtanh.f32 %v1318_v57  ;;  %v2270_v60 = vmul.f32 -1.442695, %v1318_v57 }
0x148d   :  { %2788 = vpow2.f32 %v2264_v35 }
0x148e   :  { %2790 = vpow2.f32 %v2270_v60 }
0x1490   :  { %v2785_v59 = vpop.eup %2784 }
0x1491   :  { %1109 = vrot.lane.b32.xlu0 %v2785_v59, %s2982_s27 }
0x1496   :  { %v2787_v12 = vpop.eup %2786 }
0x1497   :  { %1328 = vrot.lane.b32.xlu1 %v2787_v12, %s2982_s27  ;;  %v2789_v61 = vpop.eup %2788 }
0x1498   :  { %v1100_v63 = vadd.f32 1.0, %v2789_v61  ;;  %v2791_v2 = vpop.eup %2790 }
0x1499   :  { %v1322_v62 = vadd.f32 1.0, %v2791_v2 }
0x149a   :  { %2792 = vrcp.f32 %v1100_v63 }
0x149b   :  { %2794 = vrcp.f32 %v1322_v62 }
0x14a4   :  { %v2793_v3 = vpop.eup %2792 }
0x14a5   :  { %v2795_v14 = vpop.eup %2794  ;;  %v1107_v13 = vmul.f32 %v2793_v3, %v1105_v11 }
0x14a6   :  { %v1326_v17 = vmul.f32 0.0, %v2795_v14 }
0x1503   :  { %v1110_v7 = vpop.permute.xlu0 %1109 }
0x1504   :  { %v1112_v4 = vmul.f32 %v2793_v3, %v1110_v7 }
0x1506   :  { %1114 = vrot.lane.b32.xlu0 %v1112_v4, %s2983_s3 }
0x1509   :  { %v1329_v5 = vpop.permute.xlu1 %1328 }
0x150a   :  { %v1331_v8 = vmul.f32 %v2795_v14, %v1329_v5 }
0x150c   :  { %1333 = vrot.lane.b32.xlu1 %v1331_v8, %s2983_s3 }
0x1578   :  { %v1115_v15 = vpop.permute.xlu0 %1114 }
0x1579   :  { %v1117_v16 = vadd.f32 %v1115_v15, %v1107_v13 }
0x157b   :  { %2796 = vtanh.f32 %v1117_v16 }
0x157e   :  { %v1334_v18 = vpop.permute.xlu1 %1333 }
0x157f   :  { %v1336_v19 = vadd.f32 %v1334_v18, %v1326_v17 }
0x1581   :  { %2798 = vtanh.f32 %v1336_v19  ;;  %v1430_v43 = vrot.slane %v1336_v19, 4 }
0x1585   :  { %v2797_v20 = vpop.eup %2796 }
0x1586   :  { %1120 = vrot.lane.b32.xlu0 %v2797_v20, %s2982_s27 }
0x158a   :  { %1151 = vrot.lane.b32.xlu0 %v1126_v21, %s2983_s3 }
0x158b   :  { %v2799_v22 = vpop.eup %2798 }
0x158c   :  { %1339 = vrot.lane.b32.xlu1 %v2799_v22, %s2982_s27 }
0x15f8   :  { %v1121_v23 = vpop.permute.xlu0 %1120 }
0x15f9   :  { %v1123_v24 = vmul.f32 %v2793_v3, %v1121_v23 }
0x15fb   :  { %v1127_v25 = vsel %vm174_vm7, %v3326_v39, %v1123_v24 }
0x15fc   :  { %v1152_v26 = vpop.permute.xlu0 %1151  ;;  %1153 = vrot.lane.b32.xlu1 %v1127_v25, %s2983_s3 }
0x15fd   :  { %2498 = vmatprep.mubr.msk.f32.mxu1 %vm289_vm9, %v1152_v26 }
0x15fe   :  { %v1340_v27 = vpop.permute.xlu1 %1339 }
0x15ff   :  { %v3385_v28 = vmul.f32 %v2795_v14, %v1340_v27 }
0x1601   :  { %1344 = vrot.lane.b32.xlu0 %v3385_v28, %s2983_s3 }
0x166e   :  { %v1154_v52 = vpop.permute.xlu1 %1153 }
0x166f   :  { %2499 = vmatmul.mubr.msk.f32.gmra.mrb[14].mxu1 %vm289_vm9, %v1154_v52 }
0x1670   :  { %2520 = vmatprep.mubr.msk.f32.mxu1 %vm2980_vm0, %v2981_v1 }
0x1673   :  { %v1345_v6 = vpop.permute.xlu0 %1344 }
0x1674   :  { %2521 = vmatmul.mubr.msk.f32.vlgmr.msra.gmra.mrb[16].mxu1 %vm289_vm9, %v1345_v6 }
0x1675   :  { %2679 = vmatpush3.bf16.msra.mxu1 %v3335_v42  ;;  %2542 = vmatprep.mubr.msk.f32.mxu1 %vm2980_vm0, %v2981_v1 }
0x1676   :  { %2680 = vmatprep.subr.bf16.mxu1 %v2979_v0 }
0x1679   :  { %2682 = vmatpush3.bf16.msra.mxu1 %v3339_v46 }
0x167a   :  { %2689 = vmatprep.subr.bf16.mxu1 %v2979_v0 }
0x1742   :  { %v3399_v9 = vpop.f32.mrb[14].mxu1 }
0x1743   :  { %v3401_v29 = vpop.f32.mrb[15].mxu1 }
0x1747   :  { %v1414_v32 = vpop.f32.mrb[16].mxu1 }
0x1748   :  { %v1419_v33 = vrot.slane %v1414_v32, 4  ;;  %v2522_v34 = vpop.f32.mrb[17].mxu1 }
0x174a   :  { %v1421_v36 = vadd.f32 %v1419_v33, %v3367_v55  ;;  %v1235_v55 = vadd.f32 %v3364_v53, %v3362_v50 }
0x174c   :  { %2800 = vtanh.f32 %v1421_v36  ;;  %v2272_v38 = vmul.f32 -1.442695, %v1421_v36  ;;  %v1240_v36 = vadd.f32 %v3362_v50, %v3401_v29 }
0x174e   :  { %2802 = vpow2.f32 %v2272_v38 }
0x1756   :  { %v2801_v37 = vpop.eup %2800 }
0x1757   :  { %1434 = vrot.lane.b32.xlu1 %v2801_v37, %s2982_s27 }
0x1758   :  { %v2803_v39 = vpop.eup %2802 }
0x1759   :  { %v1425_v40 = vadd.f32 1.0, %v2803_v39 }
0x175b   :  { %2804 = vrcp.f32 %v1425_v40 }
0x1765   :  { %v2805_v31 = vpop.eup %2804 }
0x1766   :  { %v1432_v44 = vmul.f32 %v2805_v31, %v1430_v43 }
0x17c9   :  { %v1435_v51 = vpop.permute.xlu1 %1434 }
0x17ca   :  { %v1437_v41 = vmul.f32 %v2805_v31, %v1435_v51 }
0x17cc   :  { %1439 = vrot.lane.b32.xlu0 %v1437_v41, %s2983_s3 }
0x183e   :  { %v1440_v45 = vpop.permute.xlu0 %1439 }
0x183f   :  { %v1442_v10 = vadd.f32 %v1440_v45, %v1432_v44 }
0x1841   :  { %2806 = vtanh.f32 %v1442_v10  ;;  %v1534_v62 = vrot.slane %v1442_v10, 4 }
0x184b   :  { %v2807_v30 = vpop.eup %2806 }
0x184c   :  { %1445 = vrot.lane.b32.xlu1 %v2807_v30, %s2982_s27 }
0x18be   :  { %v1446_v47 = vpop.permute.xlu1 %1445 }
0x18bf   :  { %v3407_v48 = vmul.f32 %v2805_v31, %v1446_v47 }
0x18c1   :  { %v1450_v49 = vrot.slane %v3407_v48, 4 }
0x18c3   :  { %1451 = vrot.lane.b32.xlu0 %v1450_v49, %s2983_s3 }
0x1935   :  { %v1452_v54 = vpop.permute.xlu0 %1451 }
0x1936   :  { %2532 = vmatmul.mubr.msk.f32.vlgmr.msra.gmra.mrb[10].mxu0 %vm289_vm9, %v1452_v54 }
0x1937   :  { %2685 = vmatpush3.bf16.msra.mxu0 %v3335_v42  ;;  %2553 = vmatprep.mubr.msk.f32.mxu0 %vm2980_vm0, %v2981_v1 }
0x1938   :  { %2686 = vmatprep.subr.bf16.mxu0 %v2979_v0 }
0x193b   :  { %2688 = vmatpush3.bf16.msra.mxu0 %v3339_v46 }
0x193c   :  { %2695 = vmatprep.subr.bf16.mxu0 %v2979_v0 }
0x1a09   :  { %v1521_v56 = vpop.f32.mrb[10].mxu0 }
0x1a0a   :  { %v1525_v57 = vadd.f32 %v1521_v56, %v1235_v55  ;;  %v2533_v58 = vpop.f32.mrb[11].mxu0 }
0x1a0c   :  { %2808 = vtanh.f32 %v1525_v57  ;;  %v2274_v12 = vmul.f32 -1.442695, %v1525_v57 }
0x1a0e   :  { %2810 = vpow2.f32 %v2274_v12 }
0x1a16   :  { %v2809_v59 = vpop.eup %2808 }
0x1a17   :  { %1538 = vrot.lane.b32.xlu1 %v2809_v59, %s2982_s27 }
0x1a18   :  { %v2811_v35 = vpop.eup %2810 }
0x1a19   :  { %v1529_v60 = vadd.f32 1.0, %v2811_v35 }
0x1a1b   :  { %2812 = vrcp.f32 %v1529_v60 }
0x1a25   :  { %v2813_v61 = vpop.eup %2812 }
0x1a26   :  { %v1536_v3 = vmul.f32 %v2813_v61, %v1534_v62 }
0x1a89   :  { %v1539_v63 = vpop.permute.xlu1 %1538 }
0x1a8a   :  { %v1541_v2 = vmul.f32 %v2813_v61, %v1539_v63 }
0x1a8c   :  { %1543 = vrot.lane.b32.xlu0 %v1541_v2, %s2983_s3 }
0x1afe   :  { %v1544_v53 = vpop.permute.xlu0 %1543 }
0x1aff   :  { %v1546_v7 = vadd.f32 %v1544_v53, %v1536_v3 }
0x1b01   :  { %2814 = vtanh.f32 %v1546_v7  ;;  %v1640_v24 = vrot.slane %v1546_v7, 4 }
0x1b0b   :  { %v2815_v4 = vpop.eup %2814 }
0x1b0c   :  { %1549 = vrot.lane.b32.xlu1 %v2815_v4, %s2982_s27 }
0x1b7e   :  { %v1550_v14 = vpop.permute.xlu1 %1549 }
0x1b7f   :  { %v3423_v5 = vmul.f32 %v2813_v61, %v1550_v14 }
0x1b81   :  { %1554 = vrot.lane.b32.xlu0 %v3423_v5, %s2983_s3 }
0x1bf3   :  { %v1555_v8 = vpop.permute.xlu0 %1554 }
0x1bf4   :  { %2543 = vmatmul.mubr.msk.f32.vlgmr.msra.gmra.mrb[18].mxu1 %vm289_vm9, %v1555_v8 }
0x1bf5   :  { %2691 = vmatpush3.bf16.msra.mxu1 %v3335_v42  ;;  %2564 = vmatprep.mubr.msk.f32.mxu1 %vm2980_vm0, %v2981_v1 }
0x1bf6   :  { %2692 = vmatprep.subr.bf16.mxu1 %v2979_v0 }
0x1bf9   :  { %2694 = vmatpush3.bf16.msra.mxu1 %v3339_v46 }
0x1bfa   :  { %2701 = vmatprep.subr.bf16.mxu1 %v2979_v0 }
0x1cc7   :  { %v1624_v11 = vpop.f32.mrb[18].mxu1 }
0x1cc8   :  { %v1629_v13 = vrot.slane %v1624_v11, 4  ;;  %v2544_v15 = vpop.f32.mrb[19].mxu1  ;;  %v1245_v11 = vadd.f32 %v3399_v9, %v3362_v50 }
0x1cca   :  { %v1631_v16 = vadd.f32 %v1629_v13, %v1235_v55 }
0x1ccc   :  { %2816 = vtanh.f32 %v1631_v16  ;;  %v2276_v18 = vmul.f32 -1.442695, %v1631_v16 }
0x1cce   :  { %2818 = vpow2.f32 %v2276_v18 }
0x1cd6   :  { %v2817_v17 = vpop.eup %2816 }
0x1cd7   :  { %1644 = vrot.lane.b32.xlu1 %v2817_v17, %s2982_s27 }
0x1cd8   :  { %v2819_v19 = vpop.eup %2818 }
0x1cd9   :  { %v1635_v20 = vadd.f32 1.0, %v2819_v19 }
0x1cdb   :  { %2820 = vrcp.f32 %v1635_v20 }
0x1ce5   :  { %v2821_v21 = vpop.eup %2820 }
0x1ce6   :  { %v1642_v25 = vmul.f32 %v2821_v21, %v1640_v24 }
0x1d49   :  { %v1645_v22 = vpop.permute.xlu1 %1644 }
0x1d4a   :  { %v1647_v23 = vmul.f32 %v2821_v21, %v1645_v22 }
0x1d4c   :  { %1649 = vrot.lane.b32.xlu0 %v1647_v23, %s2983_s3 }
0x1dbe   :  { %v1650_v26 = vpop.permute.xlu0 %1649 }
0x1dbf   :  { %v1652_v27 = vadd.f32 %v1650_v26, %v1642_v25 }
0x1dc1   :  { %2822 = vtanh.f32 %v1652_v27  ;;  %v1744_v10 = vrot.slane %v1652_v27, 4 }
0x1dcb   :  { %v2823_v52 = vpop.eup %2822 }
0x1dcc   :  { %1655 = vrot.lane.b32.xlu1 %v2823_v52, %s2982_s27 }
0x1e3e   :  { %v1656_v6 = vpop.permute.xlu1 %1655 }
0x1e3f   :  { %v3437_v32 = vmul.f32 %v2821_v21, %v1656_v6 }
0x1e41   :  { %v1660_v33 = vrot.slane %v3437_v32, 4 }
0x1e43   :  { %1661 = vrot.lane.b32.xlu0 %v1660_v33, %s2983_s3 }
0x1eb5   :  { %v1662_v34 = vpop.permute.xlu0 %1661 }
0x1eb6   :  { %2554 = vmatmul.mubr.msk.f32.vlgmr.msra.gmra.mrb[12].mxu0 %vm289_vm9, %v1662_v34 }
0x1eb7   :  { %2697 = vmatpush3.bf16.msra.mxu0 %v3335_v42  ;;  %2575 = vmatprep.mubr.msk.f32.mxu0 %vm2980_vm0, %v2981_v1 }
0x1eb8   :  { %2698 = vmatprep.subr.bf16.mxu0 %v2979_v0 }
0x1ebb   :  { %2700 = vmatpush3.bf16.msra.mxu0 %v3339_v46 }
0x1f89   :  { %v1731_v37 = vpop.f32.mrb[12].mxu0 }
0x1f8a   :  { %v1735_v38 = vadd.f32 %v1731_v37, %v1240_v36  ;;  %v2555_v39 = vpop.f32.mrb[13].mxu0 }
0x1f8c   :  { %2824 = vtanh.f32 %v1735_v38  ;;  %v2278_v31 = vmul.f32 -1.442695, %v1735_v38 }
0x1f8e   :  { %2826 = vpow2.f32 %v2278_v31 }
0x1f96   :  { %v2825_v40 = vpop.eup %2824 }
0x1f97   :  { %1748 = vrot.lane.b32.xlu1 %v2825_v40, %s2982_s27 }
0x1f98   :  { %v2827_v51 = vpop.eup %2826 }
0x1f99   :  { %v1739_v41 = vadd.f32 1.0, %v2827_v51 }
0x1f9b   :  { %2828 = vrcp.f32 %v1739_v41 }
0x1fa5   :  { %v2829_v43 = vpop.eup %2828 }
0x1fa6   :  { %v1746_v30 = vmul.f32 %v2829_v43, %v1744_v10  ;;  %v2084_v10 = vld [vmem:[#allocation9 + $0x8] sm:$0xff] }
0x2009   :  { %v1749_v44 = vpop.permute.xlu1 %1748 }
0x200a   :  { %v1751_v45 = vmul.f32 %v2829_v43, %v1749_v44  ;;  %v2079_v44 = vsel %vm174_vm7, %v3385_v28, %v3407_v48 }
0x200c   :  { %1753 = vrot.lane.b32.xlu0 %v1751_v45, %s2983_s3  ;;  %v2083_v45 = vld [vmem:[#allocation9] sm:$0xff] }
0x207e   :  { %v1754_v29 = vpop.permute.xlu0 %1753 }
0x207f   :  { %v1756_v47 = vadd.f32 %v1754_v29, %v1746_v30  ;;  %v2707_v30 = vpack.c.bf16 %v2084_v10, %v2083_v45 }
0x2081   :  { %2830 = vtanh.f32 %v1756_v47  ;;  %2708 = vmatprep.subr.bf16.mxu0 %v2707_v30 }
0x208b   :  { %v2831_v49 = vpop.eup %2830 }
0x208c   :  { %1759 = vrot.lane.b32.xlu1 %v2831_v49, %s2982_s27  ;;  %v2085_v49 = vld [vmem:[#allocation9 + $0x10] sm:$0xff] }
0x20fe   :  { %v1760_v54 = vpop.permute.xlu1 %1759 }
0x20ff   :  { %v3452_v55 = vmul.f32 %v2829_v43, %v1760_v54  ;;  %v2086_v54 = vld [vmem:[#allocation9 + $0x18] sm:$0xff] }
0x2101   :  { %1764 = vrot.lane.b32.xlu0 %v3452_v55, %s2983_s3 }
0x2173   :  { %v1765_v56 = vpop.permute.xlu0 %1764 }
0x2174   :  { %2565 = vmatmul.mubr.msk.f32.vlgmr.msra.gmra.mrb[20].mxu1 %vm289_vm9, %v1765_v56 }
0x2175   :  { %2703 = vmatpush3.bf16.msra.mxu1 %v3335_v42  ;;  %2586 = vmatprep.mubr.msk.f32.mxu1 %vm2980_vm0, %v2981_v1 }
0x2176   :  { %2704 = vmatprep.subr.bf16.mxu1 %v2979_v0  ;;  %v1850_v0 = vrot.slane %v1756_v47, 4 }
0x2179   :  { %2706 = vmatpush3.bf16.msra.mxu1 %v3339_v46 }
0x2247   :  { %v1834_v57 = vpop.f32.mrb[20].mxu1 }
0x2248   :  { %v1839_v58 = vrot.slane %v1834_v57, 4  ;;  %v2566_v59 = vpop.f32.mrb[21].mxu1  ;;  %v2711_v57 = vpack.c.bf16 %v2086_v54, %v2085_v49 }
0x224a   :  { %v1841_v12 = vadd.f32 %v1839_v58, %v1240_v36 }
0x224c   :  { %2832 = vtanh.f32 %v1841_v12  ;;  %v2280_v60 = vmul.f32 -1.442695, %v1841_v12 }
0x224e   :  { %2834 = vpow2.f32 %v2280_v60 }
0x2256   :  { %v2833_v35 = vpop.eup %2832 }
0x2257   :  { %1854 = vrot.lane.b32.xlu1 %v2833_v35, %s2982_s27 }
0x2258   :  { %v2835_v61 = vpop.eup %2834 }
0x2259   :  { %v1845_v63 = vadd.f32 1.0, %v2835_v61 }
0x225b   :  { %2836 = vrcp.f32 %v1845_v63 }
0x2265   :  { %v2837_v42 = vpop.eup %2836 }
0x2266   :  { %v1852_v46 = vmul.f32 %v2837_v42, %v1850_v0 }
0x22c9   :  { %v1855_v2 = vpop.permute.xlu1 %1854 }
0x22ca   :  { %v1857_v1 = vmul.f32 %v2837_v42, %v1855_v2 }
0x22cc   :  { %1859 = vrot.lane.b32.xlu0 %v1857_v1, %s2983_s3 }
0x233e   :  { %v1860_v62 = vpop.permute.xlu0 %1859 }
0x233f   :  { %v1862_v3 = vadd.f32 %v1860_v62, %v1852_v46 }
0x2341   :  { %2838 = vtanh.f32 %v1862_v3  ;;  %v1954_v24 = vrot.slane %v1862_v3, 4 }
0x234b   :  { %v2839_v53 = vpop.eup %2838 }
0x234c   :  { %1865 = vrot.lane.b32.xlu1 %v2839_v53, %s2982_s27 }
0x23be   :  { %v1866_v7 = vpop.permute.xlu1 %1865 }
0x23bf   :  { %v1868_v4 = vmul.f32 %v2837_v42, %v1866_v7 }
0x23c1   :  { %v1870_v14 = vrot.slane %v1868_v4, 4  ;;  %v2081_v29 = vsel %vm174_vm7, %v3452_v55, %v1868_v4  ;;  %v2080_v55 = vsel %vm174_vm7, %v3423_v5, %v3437_v32  ;;  %v2285_v5 = vld [vmem:[%s3514_s8] ss:$0 sm:$0xff] }
0x23c3   :  { %1871 = vrot.lane.b32.xlu0 %v1870_v14, %s2983_s3 }
0x2435   :  { %v1872_v8 = vpop.permute.xlu0 %1871 }
0x2436   :  { %2576 = vmatmul.mubr.msk.f32.vlgmr.msra.gmra.mrb[14].mxu0 %vm289_vm9, %v1872_v8 }
0x2437   :  { %2710 = vmatpush3.bf16.msra.mxu0 %v2707_v30 }
0x2438   :  { %2712 = vmatprep.subr.bf16.mxu0 %v2711_v57 }
0x243b   :  { %2714 = vmatpush3.bf16.msra.mxu0 %v2711_v57 }
0x2509   :  { %v1941_v13 = vpop.f32.mrb[14].mxu0 }
0x250a   :  { %v1945_v15 = vadd.f32 %v1941_v13, %v1245_v11  ;;  %v2577_v16 = vpop.f32.mrb[15].mxu0 }
0x250c   :  { %2840 = vtanh.f32 %v1945_v15  ;;  %v2282_v18 = vmul.f32 -1.442695, %v1945_v15 }
0x250e   :  { %2842 = vpow2.f32 %v2282_v18 }
0x2516   :  { %v2841_v17 = vpop.eup %2840 }
0x2517   :  { %1958 = vrot.lane.b32.xlu1 %v2841_v17, %s2982_s27 }
0x2518   :  { %v2843_v19 = vpop.eup %2842 }
0x2519   :  { %v1949_v20 = vadd.f32 1.0, %v2843_v19 }
0x251b   :  { %2844 = vrcp.f32 %v1949_v20 }
0x2525   :  { %v2845_v21 = vpop.eup %2844 }
0x2526   :  { %v1956_v25 = vmul.f32 %v2845_v21, %v1954_v24 }
0x2589   :  { %v1959_v22 = vpop.permute.xlu1 %1958 }
0x258a   :  { %v1961_v23 = vmul.f32 %v2845_v21, %v1959_v22 }
0x258c   :  { %1963 = vrot.lane.b32.xlu0 %v1961_v23, %s2983_s3 }
0x25fe   :  { %v1964_v50 = vpop.permute.xlu0 %1963 }
0x25ff   :  { %v1966_v9 = vadd.f32 %v1964_v50, %v1956_v25 }
0x2601   :  { %2846 = vtanh.f32 %v1966_v9  ;;  %v2060_v47 = vrot.slane %v1966_v9, 4 }
0x260b   :  { %v2847_v26 = vpop.eup %2846 }
0x260c   :  { %1969 = vrot.lane.b32.xlu1 %v2847_v26, %s2982_s27 }
0x267e   :  { %v1970_v27 = vpop.permute.xlu1 %1969 }
0x267f   :  { %v1972_v52 = vmul.f32 %v2845_v21, %v1970_v27 }
0x2681   :  { %1974 = vrot.lane.b32.xlu0 %v1972_v52, %s2983_s3 }
0x26f3   :  { %v1975_v6 = vpop.permute.xlu0 %1974 }
0x26f4   :  { %2587 = vmatmul.mubr.msk.f32.vlgmr.msra.gmra.mrb[22].mxu1 %vm289_vm9, %v1975_v6 }
0x27c7   :  { %v2044_v33 = vpop.f32.mrb[22].mxu1 }
0x27c8   :  { %v2049_v34 = vrot.slane %v2044_v33, 4  ;;  %v2588_v36 = vpop.f32.mrb[23].mxu1 }
0x27ca   :  { %v2051_v37 = vadd.f32 %v2049_v34, %v1245_v11 }
0x27cc   :  { %2848 = vtanh.f32 %v2051_v37  ;;  %v2284_v39 = vmul.f32 -1.442695, %v2051_v37 }
0x27ce   :  { %2850 = vpow2.f32 %v2284_v39 }
0x27d6   :  { %v2849_v38 = vpop.eup %2848 }
0x27d7   :  { %2064 = vrot.lane.b32.xlu1 %v2849_v38, %s2982_s27 }
0x27d8   :  { %v2851_v40 = vpop.eup %2850 }
0x27d9   :  { %v2055_v31 = vadd.f32 1.0, %v2851_v40 }
0x27db   :  { %2852 = vrcp.f32 %v2055_v31 }
0x27e5   :  { %v2853_v51 = vpop.eup %2852 }
0x27e6   :  { %v2062_v56 = vmul.f32 %v2853_v51, %v2060_v47 }
0x2849   :  { %v2065_v41 = vpop.permute.xlu1 %2064 }
0x284a   :  { %v2067_v43 = vmul.f32 %v2853_v51, %v2065_v41 }
0x284c   :  { %2069 = vrot.lane.b32.xlu0 %v2067_v43, %s2983_s3 }
0x2850   :  { %2098 = vrot.lane.b32.xlu0 %v2079_v44, %s2983_s3 }
0x2854   :  { %2102 = vrot.lane.b32.xlu0 %v2081_v29, %s2983_s3 }
0x28be   :  { %v2070_v58 = vpop.permute.xlu0 %2069 }
0x28bf   :  { %v2072_v59 = vadd.f32 %v2070_v58, %v2062_v56 }
0x28c1   :  { %2854 = vtanh.f32 %v2072_v59 }
0x28c2   :  { %v2099_v28 = vpop.permute.xlu0 %2098 }
0x28c3   :  { %2597 = vmatprep.mubr.msk.f32.mxu0 %vm289_vm9, %v2099_v28 }
0x28c6   :  { %v2103_v63 = vpop.permute.xlu0 %2102 }
0x28cb   :  { %v2855_v48 = vpop.eup %2854 }
0x28cc   :  { %2075 = vrot.lane.b32.xlu1 %v2855_v48, %s2982_s27 }
0x28d0   :  { %2100 = vrot.lane.b32.xlu1 %v2080_v55, %s2983_s3 }
0x293e   :  { %v2076_v12 = vpop.permute.xlu1 %2075 }
0x293f   :  { %v2078_v35 = vmul.f32 %v2853_v51, %v2076_v12 }
0x2941   :  { %v2082_v60 = vsel %vm174_vm7, %v1972_v52, %v2078_v35 }
0x2942   :  { %2104 = vrot.lane.b32.xlu1 %v2082_v60, %s2983_s3  ;;  %v2101_v61 = vpop.permute.xlu1 %2100 }
0x2943   :  { %2598 = vmatmul.mubr.msk.f32.vlgmr.msra.gmra.mrb[16].mxu0 %vm289_vm9, %v2101_v61 }
0x2944   :  { %2600 = vmatprep.mubr.msk.f32.mxu0 %vm289_vm9, %v2103_v63 }
0x29b4   :  { %v2105_v42 = vpop.permute.xlu1 %2104 }
0x29b5   :  { %2601 = vmatmul.mubr.msk.f32.gmra.mrb[18].mxu0 %vm289_vm9, %v2105_v42 }
0x2a16   :  { %v2599_v32 = vpop.f32.mrb[16].mxu0 }
0x2a17   :  { %v2180_v2 = vpop.f32.mrb[17].mxu0  ;;  %v2186_v46 = vadd.f32 %v2599_v32, %v2285_v5 }
0x2a18   :  { %v2181_v1 = vadd.f32 %v2285_v5, %v2180_v2 }
0x2a19   :  { %v2208_v62 = vrot.slane %v2186_v46, 4 }
0x2a1a   :  { %v2200_v0 = vrot.slane %v2181_v1, 4 }
0x2a1c   :  { %2201 = vrot.lane.b32.xlu0 %v2200_v0, %s2983_s3 }
0x2a20   :  { %2205 = vrot.lane.b32.xlu0 %v2186_v46, %s2982_s27 }
0x2a24   :  { %2209 = vrot.lane.b32.xlu0 %v2208_v62, %s2984_s11 }
0x2a88   :  { %v2602_v3 = vpop.f32.mrb[18].mxu0 }
0x2a89   :  { %v2196_v53 = vadd.f32 %v2602_v3, %v2285_v5  ;;  %v2190_v7 = vpop.f32.mrb[19].mxu0 }
0x2a8a   :  { %v2191_v4 = vadd.f32 %v2285_v5, %v2190_v7 }
0x2a8b   :  { %2218 = vrot.lane.b32.xlu1 %v2196_v53, %s2982_s27  ;;  %v2221_v8 = vrot.slane %v2196_v53, 4 }
0x2a8c   :  { %v2213_v14 = vrot.slane %v2191_v4, 4 }
0x2a8e   :  { %v2202_v11 = vpop.permute.xlu0 %2201 }
0x2a8f   :  { %2214 = vrot.lane.b32.xlu1 %v2213_v14, %s2983_s3  ;;  %v2225_v19 = vsel %vm289_vm9, %v2181_v1, %v2202_v11 }
0x2a92   :  { %v2206_v13 = vpop.permute.xlu0 %2205 }
0x2a93   :  { %2222 = vrot.lane.b32.xlu1 %v2221_v8, %s2984_s11  ;;  %v2227_v20 = vsel %vm2226_vm10, %v2225_v19, %v2206_v13 }
0x2a96   :  { %v2210_v18 = vpop.permute.xlu0 %2209 }
0x2a97   :  { %v2229_v23 = vsel %vm2228_vm11, %v2227_v20, %v2210_v18 }
0x2afd   :  { %v2219_v15 = vpop.permute.xlu1 %2218 }
0x2b01   :  { %v2215_v16 = vpop.permute.xlu1 %2214 }
0x2b02   :  { %v2230_v17 = vsel %vm289_vm9, %v2191_v4, %v2215_v16 }
0x2b03   :  { %v2231_v21 = vsel %vm2226_vm10, %v2230_v17, %v2219_v15 }
0x2b05   :  { %v2223_v22 = vpop.permute.xlu1 %2222 }
0x2b06   :  { %v2232_v24 = vsel %vm2228_vm11, %v2231_v21, %v2223_v22 }
0x2b07   :  { %v2235_v25 = vcombine.low %v2229_v23, %v2232_v24 }
0x2b09   :  { %2237 = vst [vmem:[%s3515_s9] sm:$0xff] %v2235_v25 }
0x2b0a   :  { %2242 = vsyncpa [#allocation3], 1 }
0x2b0b   :  { %2243 = vsyncpa [#allocation5], 1 }
0x2b0c   :  { %2244 = vsyncpa [#allocation8], 1 }

</bundles_post_ra>
